<compile_context>
chip_gen: v5e
topology: v5e:2x2
jax: 0.10.0
libtpu: 0.0.40
codegen_flags: <defaults>
</compile_context>

<pallas_src>
import functools
import math

import jax
import jax.numpy as jnp
from jax.experimental import pallas as pl
from jax.experimental.pallas import tpu as pltpu


# ----------------------------- in-kernel helpers -----------------------------

def _layernorm(x, gamma, beta, eps):
  # torch.nn.LayerNorm semantics: biased variance over the last dim.
  mu = jnp.mean(x, axis=-1, keepdims=True)
  var = jnp.mean((x - mu) ** 2, axis=-1, keepdims=True)
  return (x - mu) * jax.lax.rsqrt(var + eps) * gamma + beta


def _erf(x):
  # Abramowitz & Stegun 7.1.26 rational approximation (|err| < 1.5e-7),
  # built only from ops guaranteed to lower in Mosaic (exp/mul/add/abs/where).
  a1, a2, a3, a4, a5 = (0.254829592, -0.284496736, 1.421413741,
                        -1.453152027, 1.061405429)
  p = 0.3275911
  s = jnp.where(x >= 0.0, 1.0, -1.0)
  z = jnp.abs(x)
  t = 1.0 / (1.0 + p * z)
  poly = ((((a5 * t + a4) * t + a3) * t + a2) * t + a1) * t
  return s * (1.0 - poly * jnp.exp(-z * z))


def _gelu(x):
  # nn.GELU() default = exact (erf-based) GELU.
  return 0.5 * x * (1.0 + _erf(x * (1.0 / math.sqrt(2.0))))


# ----------------------------- fused ViT kernel ------------------------------

def _vit_kernel(n_heads, head_dim,
                patches_ref, embed_w_ref, embed_b_ref, pos_ref, bias_ref,
                ln1g_ref, ln1b_ref, wqkv_ref, bqkv_ref, wo_ref, bo_ref,
                ln2g_ref, ln2b_ref, w1_ref, b1_ref, w2_ref, b2_ref,
                normg_ref, normb_ref,
                out_ref,
                x_ref, ctx_ref):
  l = pl.program_id(0)
  n_layers = pl.num_programs(0)
  D = n_heads * head_dim

  # ---- grid step 0: patch embedding (Conv2d-as-matmul) + position emb ----
  @pl.when(l == 0)
  def _():
    x_ref[...] = (jnp.dot(patches_ref[...], embed_w_ref[...],
                          preferred_element_type=jnp.float32)
                  + embed_b_ref[...] + pos_ref[...])

  x = x_ref[...]                                 # (B*N, D) residual stream

  # ---- attention sub-block ----
  h = _layernorm(x, ln1g_ref[0], ln1b_ref[0], 1e-6)
  qkv = (jnp.dot(h, wqkv_ref[0], preferred_element_type=jnp.float32)
         + bqkv_ref[0])                          # fused Q|K|V: (B*N, 3D)

  scale = 1.0 / math.sqrt(head_dim)
  bias = bias_ref[...]                           # block-diag batch mask, hoisted
  for hh in range(n_heads):                      # static, tiny H; no concat
    lo = hh * head_dim
    q_h = qkv[:, lo:lo + head_dim]
    k_h = qkv[:, D + lo:D + lo + head_dim]
    v_h = qkv[:, 2 * D + lo:2 * D + lo + head_dim]
    s = jnp.dot(q_h, k_h.T, preferred_element_type=jnp.float32) * scale + bias
    s = s - jnp.max(s, axis=-1, keepdims=True)
    e = jnp.exp(s)
    p = e / jnp.sum(e, axis=-1, keepdims=True)   # softmax(dim=-1) per batch
    ctx_ref[:, lo:lo + head_dim] = jnp.dot(p, v_h,
                                           preferred_element_type=jnp.float32)

  attn = (jnp.dot(ctx_ref[...], wo_ref[0], preferred_element_type=jnp.float32)
          + bo_ref[0])
  x = x + attn

  # ---- MLP sub-block ----
  h2 = _layernorm(x, ln2g_ref[0], ln2b_ref[0], 1e-6)
  m = jnp.dot(h2, w1_ref[0], preferred_element_type=jnp.float32) + b1_ref[0]
  m = _gelu(m)
  m = jnp.dot(m, w2_ref[0], preferred_element_type=jnp.float32) + b2_ref[0]
  x = x + m
  x_ref[...] = x                                 # carry residual to next layer

  # ---- last grid step: Encoder.norm = nn.LayerNorm(D) (default eps=1e-5) ----
  @pl.when(l == n_layers - 1)
  def _():
    out_ref[...] = _layernorm(x, normg_ref[...], normb_ref[...], 1e-5)


# --------------------------------- wrapper -----------------------------------

def vit_forward(x_nchw, params, patch_size, n_heads):
  """x_nchw: (B, C, H, W) float32.  Returns (B, n_patches, hidden_dim)."""
  B, C, H, W = x_nchw.shape
  p = patch_size
  Hp, Wp = H // p, W // p
  N = Hp * Wp
  P = C * p * p
  D = params["embed_w"].shape[1]
  M = params["w1"].shape[2]
  L = params["wqkv"].shape[0]
  BN = B * N
  head_dim = D // n_heads

  # Patch extraction = Conv2d(kernel=stride=p) as im2col (host glue).
  # Patch vector ordering (C, kh, kw) matches torch conv weight (D, C, kh, kw).
  patches = x_nchw.reshape(B, C, Hp, p, Wp, p)
  patches = patches.transpose(0, 2, 4, 1, 3, 5).reshape(BN, P)

  # Host plumbing: tile pos-emb over batch; block-diagonal additive bias so
  # attention over the folded (B*N) token axis never mixes batch elements.
  pos2d = jnp.tile(params["pos"], (B, 1))                        # (BN, D)
  tok_batch = jnp.arange(BN, dtype=jnp.int32) // N
  same = tok_batch[:, None] == tok_batch[None, :]
  attn_bias = jnp.where(same, 0.0, -1e30).astype(jnp.float32)    # (BN, BN)

  def const_spec(shape):
    return pl.BlockSpec(shape, lambda l: (0,) * len(shape))

  def layer_spec(shape_rest):
    return pl.BlockSpec((1,) + shape_rest,
                        lambda l: (l,) + (0,) * len(shape_rest))

  kern = functools.partial(_vit_kernel, n_heads, head_dim)
  out = pl.pallas_call(
      kern,
      out_shape=jax.ShapeDtypeStruct((BN, D), jnp.float32),
      grid=(L,),
      in_specs=[
          const_spec((BN, P)),                         # patches
          const_spec((P, D)), const_spec((1, D)),      # embed W, b
          const_spec((BN, D)), const_spec((BN, BN)),   # pos, attn bias mask
          layer_spec((1, D)), layer_spec((1, D)),      # ln1 gamma, beta
          layer_spec((D, 3 * D)), layer_spec((1, 3 * D)),  # Wqkv, bqkv (fused)
          layer_spec((D, D)), layer_spec((1, D)),      # Wo, bo
          layer_spec((1, D)), layer_spec((1, D)),      # ln2 gamma, beta
          layer_spec((D, M)), layer_spec((1, M)),      # fc1
          layer_spec((M, D)), layer_spec((1, D)),      # fc2
          const_spec((1, D)), const_spec((1, D)),      # encoder norm g, b
      ],
      out_specs=const_spec((BN, D)),
      scratch_shapes=[pltpu.VMEM((BN, D), jnp.float32),   # residual stream x
                      pltpu.VMEM((BN, D), jnp.float32)],  # attention context
      compiler_params=pltpu.CompilerParams(
          dimension_semantics=("arbitrary",)),
  )(patches, params["embed_w"], params["embed_b"], pos2d, attn_bias,
    params["ln1_g"], params["ln1_b"], params["wqkv"], params["bqkv"],
    params["wo"], params["bo"], params["ln2_g"], params["ln2_b"],
    params["w1"], params["b1"], params["w2"], params["b2"],
    params["norm_g"], params["norm_b"])
  return out.reshape(B, N, D)


# ------------------------------- param init ----------------------------------

def init_params(key, *, hidden_dim, n_layers, mlp_dim, in_channels,
                patch_size, n_patches):
  D, M, C, p, N = hidden_dim, mlp_dim, in_channels, patch_size, n_patches
  P = C * p * p

  def draw(shape, scale=0.02):
    nonlocal key
    key, sub = jax.random.split(key)               # split lazily: no key-count bug
    return (scale * jax.random.normal(sub, shape)).astype(jnp.float32)

  def stack(fn):
    return jnp.stack([fn() for _ in range(n_layers)], axis=0)

  # Conv2d weight (D, C, p, p) flattened & transposed -> (P, D) for x @ W.
  conv_w = draw((D, C, p, p)).reshape(D, P).T
  params = {
      "embed_w": conv_w,
      "embed_b": draw((1, D), 0.01),
      # reference uses nn.Parameter(zeros); random here so the add is exercised
      "pos": draw((N, D), 0.02),
      "norm_g": jnp.ones((1, D), jnp.float32),
      "norm_b": jnp.zeros((1, D), jnp.float32),
      "ln1_g": jnp.ones((n_layers, 1, D), jnp.float32),
      "ln1_b": jnp.zeros((n_layers, 1, D), jnp.float32),
      "ln2_g": jnp.ones((n_layers, 1, D), jnp.float32),
      "ln2_b": jnp.zeros((n_layers, 1, D), jnp.float32),
      # nn.Linear weights are (out, in); pre-transposed to (in, out) and the
      # Q|K|V projections pre-concatenated along the output dim.
      "wqkv": stack(lambda: draw((D, 3 * D))),
      "bqkv": stack(lambda: draw((1, 3 * D), 0.01)),
      "wo": stack(lambda: draw((D, D))),
      "bo": stack(lambda: draw((1, D), 0.01)),
      "w1": stack(lambda: draw((D, M))),
      "b1": stack(lambda: draw((1, M), 1e-6)),
      "w2": stack(lambda: draw((M, D))),
      "b2": stack(lambda: draw((1, D), 1e-6)),
  }
  return params


# ----------------------------------- main -------------------------------------

if __name__ == "__main__":
  # ViT config (small):
  hidden_dim = 32
  transformer_n_layers = 2
  mlp_dim = 64
  n_heads = 4
  dropout_rate = 0.0          # dropout -> identity (eval semantics)
  img_size = (256, 256)
  in_channels = 4
  grid_size = (4, 4)

  # From Embeddings.__init__:
  #   patch_size = (256//16//4, 256//16//4) = (4, 4)
  #   patch_size_real = (64, 64);  n_patches = (256//64) * (256//64) = 16
  # Hybrid-ViT convention: the conv input is the 16x-downsampled feature map,
  # so x is (B, in_channels, 16, 16) and the conv yields exactly 16 patches.
  patch_size = img_size[0] // 16 // grid_size[0]          # 4
  n_patches = ((img_size[0] // (patch_size * 16))
               * (img_size[1] // (patch_size * 16)))      # 16
  B = 2
  feat = img_size[0] // 16                                # 16

  key = jax.random.PRNGKey(0)
  kx, kp = jax.random.split(key)
  x = jax.random.normal(kx, (B, in_channels, feat, feat), dtype=jnp.float32)

  params = init_params(kp, hidden_dim=hidden_dim, n_layers=transformer_n_layers,
                       mlp_dim=mlp_dim, in_channels=in_channels,
                       patch_size=patch_size, n_patches=n_patches)

  fwd = jax.jit(functools.partial(vit_forward, patch_size=patch_size,
                                  n_heads=n_heads))
  out = jax.block_until_ready(fwd(x, params))
  assert out.shape == (B, n_patches, hidden_dim), out.shape
  assert bool(jnp.all(jnp.isfinite(out)))
  print("KERNEL_OK")
</pallas_src>

<mosaic_0001>
module attributes {stable_mosaic.version = 11 : i64} {
  func.func @_vit_kernel(%arg0: i32, %arg1: memref<32x64xf32, #tpu.memory_space<vmem>>, %arg2: memref<64x32xf32, #tpu.memory_space<vmem>>, %arg3: memref<1x32xf32, #tpu.memory_space<vmem>>, %arg4: memref<32x32xf32, #tpu.memory_space<vmem>>, %arg5: memref<32x32xf32, #tpu.memory_space<vmem>>, %arg6: memref<1x1x32xf32, #tpu.memory_space<vmem>>, %arg7: memref<1x1x32xf32, #tpu.memory_space<vmem>>, %arg8: memref<1x32x96xf32, #tpu.memory_space<vmem>>, %arg9: memref<1x1x96xf32, #tpu.memory_space<vmem>>, %arg10: memref<1x32x32xf32, #tpu.memory_space<vmem>>, %arg11: memref<1x1x32xf32, #tpu.memory_space<vmem>>, %arg12: memref<1x1x32xf32, #tpu.memory_space<vmem>>, %arg13: memref<1x1x32xf32, #tpu.memory_space<vmem>>, %arg14: memref<1x32x64xf32, #tpu.memory_space<vmem>>, %arg15: memref<1x1x64xf32, #tpu.memory_space<vmem>>, %arg16: memref<1x64x32xf32, #tpu.memory_space<vmem>>, %arg17: memref<1x1x32xf32, #tpu.memory_space<vmem>>, %arg18: memref<1x32xf32, #tpu.memory_space<vmem>>, %arg19: memref<1x32xf32, #tpu.memory_space<vmem>>, %arg20: memref<32x32xf32, #tpu.memory_space<vmem>>, %arg21: memref<32x32xf32, #tpu.memory_space<vmem>>, %arg22: memref<32x32xf32, #tpu.memory_space<vmem>>) attributes {dimension_semantics = [#tpu.dimension_semantics<arbitrary>], iteration_bounds = array<i64: 2>, scalar_prefetch = 0 : i64, scratch_operands = 2 : i64, tpu.core_type = #tpu.core_type<tc>, window_params = [{pipeline_mode = #tpu.pipeline_mode<synchronous>, transform_indices = @transform_0, window_bounds = array<i64: 32, 64>}, {pipeline_mode = #tpu.pipeline_mode<synchronous>, transform_indices = @transform_1, window_bounds = array<i64: 64, 32>}, {pipeline_mode = #tpu.pipeline_mode<synchronous>, transform_indices = @transform_2, window_bounds = array<i64: 1, 32>}, {pipeline_mode = #tpu.pipeline_mode<synchronous>, transform_indices = @transform_3, window_bounds = array<i64: 32, 32>}, {pipeline_mode = #tpu.pipeline_mode<synchronous>, transform_indices = @transform_4, window_bounds = array<i64: 32, 32>}, {transform_indices = @transform_5, window_bounds = array<i64: 1, 1, 32>}, {transform_indices = @transform_6, window_bounds = array<i64: 1, 1, 32>}, {transform_indices = @transform_7, window_bounds = array<i64: 1, 32, 96>}, {transform_indices = @transform_8, window_bounds = array<i64: 1, 1, 96>}, {transform_indices = @transform_9, window_bounds = array<i64: 1, 32, 32>}, {transform_indices = @transform_10, window_bounds = array<i64: 1, 1, 32>}, {transform_indices = @transform_11, window_bounds = array<i64: 1, 1, 32>}, {transform_indices = @transform_12, window_bounds = array<i64: 1, 1, 32>}, {transform_indices = @transform_13, window_bounds = array<i64: 1, 32, 64>}, {transform_indices = @transform_14, window_bounds = array<i64: 1, 1, 64>}, {transform_indices = @transform_15, window_bounds = array<i64: 1, 64, 32>}, {transform_indices = @transform_16, window_bounds = array<i64: 1, 1, 32>}, {pipeline_mode = #tpu.pipeline_mode<synchronous>, transform_indices = @transform_17, window_bounds = array<i64: 1, 32>}, {pipeline_mode = #tpu.pipeline_mode<synchronous>, transform_indices = @transform_18, window_bounds = array<i64: 1, 32>}, {pipeline_mode = #tpu.pipeline_mode<synchronous>, transform_indices = @transform_19, window_bounds = array<i64: 32, 32>}]} {
    %c0_i32 = arith.constant 0 : i32
    %0 = arith.cmpi eq, %arg0, %c0_i32 : i32
    %1 = arith.extui %0 : i1 to i32
    %c0_i32_0 = arith.constant 0 : i32
    %2 = arith.cmpi ne, %1, %c0_i32_0 : i32
    scf.if %2 {
      %c0_99 = arith.constant 0 : index
      %c0_100 = arith.constant 0 : index
      %209 = vector.load %arg1[%c0_99, %c0_100] : memref<32x64xf32, #tpu.memory_space<vmem>>, vector<32x64xf32>
      %c0_101 = arith.constant 0 : index
      %c0_102 = arith.constant 0 : index
      %210 = vector.load %arg2[%c0_101, %c0_102] : memref<64x32xf32, #tpu.memory_space<vmem>>, vector<64x32xf32>
      %cst_103 = arith.constant dense<0.000000e+00> : vector<32x32xf32>
      %211 = tpu.matmul %209, %210, %cst_103 {dimension_numbers = #tpu.dot_dimension_numbers<[1], [0], [0], [1], [0, 0, 1, 1], [], []>} : vector<32x64xf32>, vector<64x32xf32>, vector<32x32xf32> -> vector<32x32xf32>
      %c0_104 = arith.constant 0 : index
      %c0_105 = arith.constant 0 : index
      %212 = vector.load %arg3[%c0_104, %c0_105] : memref<1x32xf32, #tpu.memory_space<vmem>>, vector<1x32xf32>
      %213 = vector.broadcast %212 : vector<1x32xf32> to vector<32x32xf32>
      %214 = arith.addf %211, %213 : vector<32x32xf32>
      %c0_106 = arith.constant 0 : index
      %c0_107 = arith.constant 0 : index
      %215 = vector.load %arg4[%c0_106, %c0_107] : memref<32x32xf32, #tpu.memory_space<vmem>>, vector<32x32xf32>
      %216 = arith.addf %214, %215 : vector<32x32xf32>
      %c0_108 = arith.constant 0 : index
      %c0_109 = arith.constant 0 : index
      %217 = vector.load %arg21[%c0_108, %c0_109] : memref<32x32xf32, #tpu.memory_space<vmem>>, vector<32x32xf32>
      tpu.vector_store %arg21[%c0_108, %c0_109], %216 {strides = array<i32>} : memref<32x32xf32, #tpu.memory_space<vmem>>, vector<32x32xf32>,
    } else {
    }
    %c0 = arith.constant 0 : index
    %c0_1 = arith.constant 0 : index
    %3 = vector.load %arg21[%c0, %c0_1] : memref<32x32xf32, #tpu.memory_space<vmem>>, vector<32x32xf32>
    %c0_2 = arith.constant 0 : index
    %c0_3 = arith.constant 0 : index
    %c0_4 = arith.constant 0 : index
    %4 = vector.load %arg6[%c0_2, %c0_3, %c0_4] : memref<1x1x32xf32, #tpu.memory_space<vmem>>, vector<1x1x32xf32>
    %5 = vector.shape_cast %4 : vector<1x1x32xf32> to vector<1x32xf32>
    %c0_5 = arith.constant 0 : index
    %c0_6 = arith.constant 0 : index
    %c0_7 = arith.constant 0 : index
    %6 = vector.load %arg7[%c0_5, %c0_6, %c0_7] : memref<1x1x32xf32, #tpu.memory_space<vmem>>, vector<1x1x32xf32>
    %7 = vector.shape_cast %6 : vector<1x1x32xf32> to vector<1x32xf32>
    %cst = arith.constant dense<0.000000e+00> : vector<32xf32>
    %8 = vector.multi_reduction <add>, %3, %cst [1] : vector<32x32xf32> to vector<32xf32>
    %9 = vector.shape_cast %8 : vector<32xf32> to vector<32x1xf32>
    %cst_8 = arith.constant 3.200000e+01 : f32
    %10 = vector.broadcast %cst_8 : f32 to vector<32x1xf32>
    %11 = arith.divf %9, %10 : vector<32x1xf32>
    %12 = vector.broadcast %11 : vector<32x1xf32> to vector<32x32xf32>
    %13 = arith.subf %3, %12 : vector<32x32xf32>
    %14 = arith.mulf %13, %13 : vector<32x32xf32>
    %cst_9 = arith.constant dense<0.000000e+00> : vector<32xf32>
    %15 = vector.multi_reduction <add>, %14, %cst_9 [1] : vector<32x32xf32> to vector<32xf32>
    %16 = vector.shape_cast %15 : vector<32xf32> to vector<32x1xf32>
    %cst_10 = arith.constant 3.200000e+01 : f32
    %17 = vector.broadcast %cst_10 : f32 to vector<32x1xf32>
    %18 = arith.divf %16, %17 : vector<32x1xf32>
    %19 = vector.broadcast %11 : vector<32x1xf32> to vector<32x32xf32>
    %20 = arith.subf %3, %19 : vector<32x32xf32>
    %cst_11 = arith.constant 9.99999997E-7 : f32
    %21 = vector.broadcast %cst_11 : f32 to vector<32x1xf32>
    %22 = arith.addf %18, %21 : vector<32x1xf32>
    %23 = math.rsqrt %22 : vector<32x1xf32>
    %24 = vector.broadcast %23 : vector<32x1xf32> to vector<32x32xf32>
    %25 = arith.mulf %20, %24 : vector<32x32xf32>
    %26 = vector.broadcast %5 : vector<1x32xf32> to vector<32x32xf32>
    %27 = arith.mulf %25, %26 : vector<32x32xf32>
    %28 = vector.broadcast %7 : vector<1x32xf32> to vector<32x32xf32>
    %29 = arith.addf %27, %28 : vector<32x32xf32>
    %c0_12 = arith.constant 0 : index
    %c0_13 = arith.constant 0 : index
    %c0_14 = arith.constant 0 : index
    %30 = vector.load %arg8[%c0_12, %c0_13, %c0_14] : memref<1x32x96xf32, #tpu.memory_space<vmem>>, vector<1x32x96xf32>
    %31 = vector.shape_cast %30 : vector<1x32x96xf32> to vector<32x96xf32>
    %cst_15 = arith.constant dense<0.000000e+00> : vector<32x96xf32>
    %32 = tpu.matmul %29, %31, %cst_15 {dimension_numbers = #tpu.dot_dimension_numbers<[1], [0], [0], [1], [0, 0, 1, 1], [], []>} : vector<32x32xf32>, vector<32x96xf32>, vector<32x96xf32> -> vector<32x96xf32>
    %c0_16 = arith.constant 0 : index
    %c0_17 = arith.constant 0 : index
    %c0_18 = arith.constant 0 : index
    %33 = vector.load %arg9[%c0_16, %c0_17, %c0_18] : memref<1x1x96xf32, #tpu.memory_space<vmem>>, vector<1x1x96xf32>
    %34 = vector.shape_cast %33 : vector<1x1x96xf32> to vector<1x96xf32>
    %35 = vector.broadcast %34 : vector<1x96xf32> to vector<32x96xf32>
    %36 = arith.addf %32, %35 : vector<32x96xf32>
    %c0_19 = arith.constant 0 : index
    %c0_20 = arith.constant 0 : index
    %37 = vector.load %arg5[%c0_19, %c0_20] : memref<32x32xf32, #tpu.memory_space<vmem>>, vector<32x32xf32>
    %38 = vector.extract_strided_slice %36 {offsets = [0, 0], sizes = [32, 8], strides = [1, 1]} : vector<32x96xf32> to vector<32x8xf32>
    %39 = vector.extract_strided_slice %36 {offsets = [0, 32], sizes = [32, 8], strides = [1, 1]} : vector<32x96xf32> to vector<32x8xf32>
    %40 = vector.extract_strided_slice %36 {offsets = [0, 64], sizes = [32, 8], strides = [1, 1]} : vector<32x96xf32> to vector<32x8xf32>
    %41 = tpu.transpose %39, [1, 0] : vector<32x8xf32> -> vector<8x32xf32>
    %cst_21 = arith.constant dense<0.000000e+00> : vector<32x32xf32>
    %42 = tpu.matmul %38, %41, %cst_21 {dimension_numbers = #tpu.dot_dimension_numbers<[1], [0], [0], [1], [0, 0, 1, 1], [], []>} : vector<32x8xf32>, vector<8x32xf32>, vector<32x32xf32> -> vector<32x32xf32>
    %cst_22 = arith.constant 0.353553385 : f32
    %43 = vector.broadcast %cst_22 : f32 to vector<32x32xf32>
    %44 = arith.mulf %42, %43 : vector<32x32xf32>
    %45 = arith.addf %44, %37 : vector<32x32xf32>
    %cst_23 = arith.constant dense<0xFF800000> : vector<32xf32>
    %46 = vector.multi_reduction <maximumf>, %45, %cst_23 [1] : vector<32x32xf32> to vector<32xf32>
    %47 = vector.shape_cast %46 : vector<32xf32> to vector<32x1xf32>
    %48 = vector.broadcast %47 : vector<32x1xf32> to vector<32x32xf32>
    %49 = arith.subf %45, %48 : vector<32x32xf32>
    %50 = math.exp %49 : vector<32x32xf32>
    %cst_24 = arith.constant dense<0.000000e+00> : vector<32xf32>
    %51 = vector.multi_reduction <add>, %50, %cst_24 [1] : vector<32x32xf32> to vector<32xf32>
    %52 = vector.shape_cast %51 : vector<32xf32> to vector<32x1xf32>
    %53 = vector.broadcast %52 : vector<32x1xf32> to vector<32x32xf32>
    %54 = arith.divf %50, %53 : vector<32x32xf32>
    %cst_25 = arith.constant dense<0.000000e+00> : vector<32x8xf32>
    %55 = tpu.matmul %54, %40, %cst_25 {dimension_numbers = #tpu.dot_dimension_numbers<[1], [0], [0], [1], [0, 0, 1, 1], [], []>} : vector<32x32xf32>, vector<32x8xf32>, vector<32x8xf32> -> vector<32x8xf32>
    %c0_26 = arith.constant 0 : index
    %c0_27 = arith.constant 0 : index
    %56 = vector.load %arg22[%c0_26, %c0_27] : memref<32x32xf32, #tpu.memory_space<vmem>>, vector<32x8xf32>
    tpu.vector_store %arg22[%c0_26, %c0_27], %55 {strides = array<i32>} : memref<32x32xf32, #tpu.memory_space<vmem>>, vector<32x8xf32>,
    %57 = vector.extract_strided_slice %36 {offsets = [0, 8], sizes = [32, 8], strides = [1, 1]} : vector<32x96xf32> to vector<32x8xf32>
    %58 = vector.extract_strided_slice %36 {offsets = [0, 40], sizes = [32, 8], strides = [1, 1]} : vector<32x96xf32> to vector<32x8xf32>
    %59 = vector.extract_strided_slice %36 {offsets = [0, 72], sizes = [32, 8], strides = [1, 1]} : vector<32x96xf32> to vector<32x8xf32>
    %60 = tpu.transpose %58, [1, 0] : vector<32x8xf32> -> vector<8x32xf32>
    %cst_28 = arith.constant dense<0.000000e+00> : vector<32x32xf32>
    %61 = tpu.matmul %57, %60, %cst_28 {dimension_numbers = #tpu.dot_dimension_numbers<[1], [0], [0], [1], [0, 0, 1, 1], [], []>} : vector<32x8xf32>, vector<8x32xf32>, vector<32x32xf32> -> vector<32x32xf32>
    %cst_29 = arith.constant 0.353553385 : f32
    %62 = vector.broadcast %cst_29 : f32 to vector<32x32xf32>
    %63 = arith.mulf %61, %62 : vector<32x32xf32>
    %64 = arith.addf %63, %37 : vector<32x32xf32>
    %cst_30 = arith.constant dense<0xFF800000> : vector<32xf32>
    %65 = vector.multi_reduction <maximumf>, %64, %cst_30 [1] : vector<32x32xf32> to vector<32xf32>
    %66 = vector.shape_cast %65 : vector<32xf32> to vector<32x1xf32>
    %67 = vector.broadcast %66 : vector<32x1xf32> to vector<32x32xf32>
    %68 = arith.subf %64, %67 : vector<32x32xf32>
    %69 = math.exp %68 : vector<32x32xf32>
    %cst_31 = arith.constant dense<0.000000e+00> : vector<32xf32>
    %70 = vector.multi_reduction <add>, %69, %cst_31 [1] : vector<32x32xf32> to vector<32xf32>
    %71 = vector.shape_cast %70 : vector<32xf32> to vector<32x1xf32>
    %72 = vector.broadcast %71 : vector<32x1xf32> to vector<32x32xf32>
    %73 = arith.divf %69, %72 : vector<32x32xf32>
    %cst_32 = arith.constant dense<0.000000e+00> : vector<32x8xf32>
    %74 = tpu.matmul %73, %59, %cst_32 {dimension_numbers = #tpu.dot_dimension_numbers<[1], [0], [0], [1], [0, 0, 1, 1], [], []>} : vector<32x32xf32>, vector<32x8xf32>, vector<32x8xf32> -> vector<32x8xf32>
    %c0_33 = arith.constant 0 : index
    %c8 = arith.constant 8 : index
    %75 = vector.load %arg22[%c0_33, %c8] : memref<32x32xf32, #tpu.memory_space<vmem>>, vector<32x8xf32>
    tpu.vector_store %arg22[%c0_33, %c8], %74 {strides = array<i32>} : memref<32x32xf32, #tpu.memory_space<vmem>>, vector<32x8xf32>,
    %76 = vector.extract_strided_slice %36 {offsets = [0, 16], sizes = [32, 8], strides = [1, 1]} : vector<32x96xf32> to vector<32x8xf32>
    %77 = vector.extract_strided_slice %36 {offsets = [0, 48], sizes = [32, 8], strides = [1, 1]} : vector<32x96xf32> to vector<32x8xf32>
    %78 = vector.extract_strided_slice %36 {offsets = [0, 80], sizes = [32, 8], strides = [1, 1]} : vector<32x96xf32> to vector<32x8xf32>
    %79 = tpu.transpose %77, [1, 0] : vector<32x8xf32> -> vector<8x32xf32>
    %cst_34 = arith.constant dense<0.000000e+00> : vector<32x32xf32>
    %80 = tpu.matmul %76, %79, %cst_34 {dimension_numbers = #tpu.dot_dimension_numbers<[1], [0], [0], [1], [0, 0, 1, 1], [], []>} : vector<32x8xf32>, vector<8x32xf32>, vector<32x32xf32> -> vector<32x32xf32>
    %cst_35 = arith.constant 0.353553385 : f32
    %81 = vector.broadcast %cst_35 : f32 to vector<32x32xf32>
    %82 = arith.mulf %80, %81 : vector<32x32xf32>
    %83 = arith.addf %82, %37 : vector<32x32xf32>
    %cst_36 = arith.constant dense<0xFF800000> : vector<32xf32>
    %84 = vector.multi_reduction <maximumf>, %83, %cst_36 [1] : vector<32x32xf32> to vector<32xf32>
    %85 = vector.shape_cast %84 : vector<32xf32> to vector<32x1xf32>
    %86 = vector.broadcast %85 : vector<32x1xf32> to vector<32x32xf32>
    %87 = arith.subf %83, %86 : vector<32x32xf32>
    %88 = math.exp %87 : vector<32x32xf32>
    %cst_37 = arith.constant dense<0.000000e+00> : vector<32xf32>
    %89 = vector.multi_reduction <add>, %88, %cst_37 [1] : vector<32x32xf32> to vector<32xf32>
    %90 = vector.shape_cast %89 : vector<32xf32> to vector<32x1xf32>
    %91 = vector.broadcast %90 : vector<32x1xf32> to vector<32x32xf32>
    %92 = arith.divf %88, %91 : vector<32x32xf32>
    %cst_38 = arith.constant dense<0.000000e+00> : vector<32x8xf32>
    %93 = tpu.matmul %92, %78, %cst_38 {dimension_numbers = #tpu.dot_dimension_numbers<[1], [0], [0], [1], [0, 0, 1, 1], [], []>} : vector<32x32xf32>, vector<32x8xf32>, vector<32x8xf32> -> vector<32x8xf32>
    %c0_39 = arith.constant 0 : index
    %c16 = arith.constant 16 : index
    %94 = vector.load %arg22[%c0_39, %c16] : memref<32x32xf32, #tpu.memory_space<vmem>>, vector<32x8xf32>
    tpu.vector_store %arg22[%c0_39, %c16], %93 {strides = array<i32>} : memref<32x32xf32, #tpu.memory_space<vmem>>, vector<32x8xf32>,
    %95 = vector.extract_strided_slice %36 {offsets = [0, 24], sizes = [32, 8], strides = [1, 1]} : vector<32x96xf32> to vector<32x8xf32>
    %96 = vector.extract_strided_slice %36 {offsets = [0, 56], sizes = [32, 8], strides = [1, 1]} : vector<32x96xf32> to vector<32x8xf32>
    %97 = vector.extract_strided_slice %36 {offsets = [0, 88], sizes = [32, 8], strides = [1, 1]} : vector<32x96xf32> to vector<32x8xf32>
    %98 = tpu.transpose %96, [1, 0] : vector<32x8xf32> -> vector<8x32xf32>
    %cst_40 = arith.constant dense<0.000000e+00> : vector<32x32xf32>
    %99 = tpu.matmul %95, %98, %cst_40 {dimension_numbers = #tpu.dot_dimension_numbers<[1], [0], [0], [1], [0, 0, 1, 1], [], []>} : vector<32x8xf32>, vector<8x32xf32>, vector<32x32xf32> -> vector<32x32xf32>
    %cst_41 = arith.constant 0.353553385 : f32
    %100 = vector.broadcast %cst_41 : f32 to vector<32x32xf32>
    %101 = arith.mulf %99, %100 : vector<32x32xf32>
    %102 = arith.addf %101, %37 : vector<32x32xf32>
    %cst_42 = arith.constant dense<0xFF800000> : vector<32xf32>
    %103 = vector.multi_reduction <maximumf>, %102, %cst_42 [1] : vector<32x32xf32> to vector<32xf32>
    %104 = vector.shape_cast %103 : vector<32xf32> to vector<32x1xf32>
    %105 = vector.broadcast %104 : vector<32x1xf32> to vector<32x32xf32>
    %106 = arith.subf %102, %105 : vector<32x32xf32>
    %107 = math.exp %106 : vector<32x32xf32>
    %cst_43 = arith.constant dense<0.000000e+00> : vector<32xf32>
    %108 = vector.multi_reduction <add>, %107, %cst_43 [1] : vector<32x32xf32> to vector<32xf32>
    %109 = vector.shape_cast %108 : vector<32xf32> to vector<32x1xf32>
    %110 = vector.broadcast %109 : vector<32x1xf32> to vector<32x32xf32>
    %111 = arith.divf %107, %110 : vector<32x32xf32>
    %cst_44 = arith.constant dense<0.000000e+00> : vector<32x8xf32>
    %112 = tpu.matmul %111, %97, %cst_44 {dimension_numbers = #tpu.dot_dimension_numbers<[1], [0], [0], [1], [0, 0, 1, 1], [], []>} : vector<32x32xf32>, vector<32x8xf32>, vector<32x8xf32> -> vector<32x8xf32>
    %c0_45 = arith.constant 0 : index
    %c24 = arith.constant 24 : index
    %113 = vector.load %arg22[%c0_45, %c24] : memref<32x32xf32, #tpu.memory_space<vmem>>, vector<32x8xf32>
    tpu.vector_store %arg22[%c0_45, %c24], %112 {strides = array<i32>} : memref<32x32xf32, #tpu.memory_space<vmem>>, vector<32x8xf32>,
    %c0_46 = arith.constant 0 : index
    %c0_47 = arith.constant 0 : index
    %114 = vector.load %arg22[%c0_46, %c0_47] : memref<32x32xf32, #tpu.memory_space<vmem>>, vector<32x32xf32>
    %c0_48 = arith.constant 0 : index
    %c0_49 = arith.constant 0 : index
    %c0_50 = arith.constant 0 : index
    %115 = vector.load %arg10[%c0_48, %c0_49, %c0_50] : memref<1x32x32xf32, #tpu.memory_space<vmem>>, vector<1x32x32xf32>
    %116 = vector.shape_cast %115 : vector<1x32x32xf32> to vector<32x32xf32>
    %cst_51 = arith.constant dense<0.000000e+00> : vector<32x32xf32>
    %117 = tpu.matmul %114, %116, %cst_51 {dimension_numbers = #tpu.dot_dimension_numbers<[1], [0], [0], [1], [0, 0, 1, 1], [], []>} : vector<32x32xf32>, vector<32x32xf32>, vector<32x32xf32> -> vector<32x32xf32>
    %c0_52 = arith.constant 0 : index
    %c0_53 = arith.constant 0 : index
    %c0_54 = arith.constant 0 : index
    %118 = vector.load %arg11[%c0_52, %c0_53, %c0_54] : memref<1x1x32xf32, #tpu.memory_space<vmem>>, vector<1x1x32xf32>
    %119 = vector.shape_cast %118 : vector<1x1x32xf32> to vector<1x32xf32>
    %120 = vector.broadcast %119 : vector<1x32xf32> to vector<32x32xf32>
    %121 = arith.addf %117, %120 : vector<32x32xf32>
    %122 = arith.addf %3, %121 : vector<32x32xf32>
    %c0_55 = arith.constant 0 : index
    %c0_56 = arith.constant 0 : index
    %c0_57 = arith.constant 0 : index
    %123 = vector.load %arg12[%c0_55, %c0_56, %c0_57] : memref<1x1x32xf32, #tpu.memory_space<vmem>>, vector<1x1x32xf32>
    %124 = vector.shape_cast %123 : vector<1x1x32xf32> to vector<1x32xf32>
    %c0_58 = arith.constant 0 : index
    %c0_59 = arith.constant 0 : index
    %c0_60 = arith.constant 0 : index
    %125 = vector.load %arg13[%c0_58, %c0_59, %c0_60] : memref<1x1x32xf32, #tpu.memory_space<vmem>>, vector<1x1x32xf32>
    %126 = vector.shape_cast %125 : vector<1x1x32xf32> to vector<1x32xf32>
    %cst_61 = arith.constant dense<0.000000e+00> : vector<32xf32>
    %127 = vector.multi_reduction <add>, %122, %cst_61 [1] : vector<32x32xf32> to vector<32xf32>
    %128 = vector.shape_cast %127 : vector<32xf32> to vector<32x1xf32>
    %cst_62 = arith.constant 3.200000e+01 : f32
    %129 = vector.broadcast %cst_62 : f32 to vector<32x1xf32>
    %130 = arith.divf %128, %129 : vector<32x1xf32>
    %131 = vector.broadcast %130 : vector<32x1xf32> to vector<32x32xf32>
    %132 = arith.subf %122, %131 : vector<32x32xf32>
    %133 = arith.mulf %132, %132 : vector<32x32xf32>
    %cst_63 = arith.constant dense<0.000000e+00> : vector<32xf32>
    %134 = vector.multi_reduction <add>, %133, %cst_63 [1] : vector<32x32xf32> to vector<32xf32>
    %135 = vector.shape_cast %134 : vector<32xf32> to vector<32x1xf32>
    %cst_64 = arith.constant 3.200000e+01 : f32
    %136 = vector.broadcast %cst_64 : f32 to vector<32x1xf32>
    %137 = arith.divf %135, %136 : vector<32x1xf32>
    %138 = vector.broadcast %130 : vector<32x1xf32> to vector<32x32xf32>
    %139 = arith.subf %122, %138 : vector<32x32xf32>
    %cst_65 = arith.constant 9.99999997E-7 : f32
    %140 = vector.broadcast %cst_65 : f32 to vector<32x1xf32>
    %141 = arith.addf %137, %140 : vector<32x1xf32>
    %142 = math.rsqrt %141 : vector<32x1xf32>
    %143 = vector.broadcast %142 : vector<32x1xf32> to vector<32x32xf32>
    %144 = arith.mulf %139, %143 : vector<32x32xf32>
    %145 = vector.broadcast %124 : vector<1x32xf32> to vector<32x32xf32>
    %146 = arith.mulf %144, %145 : vector<32x32xf32>
    %147 = vector.broadcast %126 : vector<1x32xf32> to vector<32x32xf32>
    %148 = arith.addf %146, %147 : vector<32x32xf32>
    %c0_66 = arith.constant 0 : index
    %c0_67 = arith.constant 0 : index
    %c0_68 = arith.constant 0 : index
    %149 = vector.load %arg14[%c0_66, %c0_67, %c0_68] : memref<1x32x64xf32, #tpu.memory_space<vmem>>, vector<1x32x64xf32>
    %150 = vector.shape_cast %149 : vector<1x32x64xf32> to vector<32x64xf32>
    %cst_69 = arith.constant dense<0.000000e+00> : vector<32x64xf32>
    %151 = tpu.matmul %148, %150, %cst_69 {dimension_numbers = #tpu.dot_dimension_numbers<[1], [0], [0], [1], [0, 0, 1, 1], [], []>} : vector<32x32xf32>, vector<32x64xf32>, vector<32x64xf32> -> vector<32x64xf32>
    %c0_70 = arith.constant 0 : index
    %c0_71 = arith.constant 0 : index
    %c0_72 = arith.constant 0 : index
    %152 = vector.load %arg15[%c0_70, %c0_71, %c0_72] : memref<1x1x64xf32, #tpu.memory_space<vmem>>, vector<1x1x64xf32>
    %153 = vector.shape_cast %152 : vector<1x1x64xf32> to vector<1x64xf32>
    %154 = vector.broadcast %153 : vector<1x64xf32> to vector<32x64xf32>
    %155 = arith.addf %151, %154 : vector<32x64xf32>
    %cst_73 = arith.constant 5.000000e-01 : f32
    %156 = vector.broadcast %cst_73 : f32 to vector<32x64xf32>
    %157 = arith.mulf %156, %155 : vector<32x64xf32>
    %cst_74 = arith.constant 0.707106769 : f32
    %158 = vector.broadcast %cst_74 : f32 to vector<32x64xf32>
    %159 = arith.mulf %155, %158 : vector<32x64xf32>
    %cst_75 = arith.constant 0.000000e+00 : f32
    %160 = vector.broadcast %cst_75 : f32 to vector<32x64xf32>
    %161 = arith.cmpf oge, %159, %160 : vector<32x64xf32>
    %cst_76 = arith.constant 1.000000e+00 : f32
    %cst_77 = arith.constant -1.000000e+00 : f32
    %162 = vector.broadcast %cst_76 : f32 to vector<32x64xf32>
    %163 = vector.broadcast %cst_77 : f32 to vector<32x64xf32>
    %164 = arith.select %161, %162, %163 : vector<32x64xi1>, vector<32x64xf32>
    %165 = math.absf %159 : vector<32x64xf32>
    %cst_78 = arith.constant 0.327591091 : f32
    %166 = vector.broadcast %cst_78 : f32 to vector<32x64xf32>
    %167 = arith.mulf %166, %165 : vector<32x64xf32>
    %cst_79 = arith.constant 1.000000e+00 : f32
    %168 = vector.broadcast %cst_79 : f32 to vector<32x64xf32>
    %169 = arith.addf %168, %167 : vector<32x64xf32>
    %cst_80 = arith.constant 1.000000e+00 : f32
    %170 = vector.broadcast %cst_80 : f32 to vector<32x64xf32>
    %171 = arith.divf %170, %169 : vector<32x64xf32>
    %cst_81 = arith.constant 1.06140542 : f32
    %172 = vector.broadcast %cst_81 : f32 to vector<32x64xf32>
    %173 = arith.mulf %172, %171 : vector<32x64xf32>
    %cst_82 = arith.constant -1.45315206 : f32
    %174 = vector.broadcast %cst_82 : f32 to vector<32x64xf32>
    %175 = arith.addf %173, %174 : vector<32x64xf32>
    %176 = arith.mulf %175, %171 : vector<32x64xf32>
    %cst_83 = arith.constant 1.42141378 : f32
    %177 = vector.broadcast %cst_83 : f32 to vector<32x64xf32>
    %178 = arith.addf %176, %177 : vector<32x64xf32>
    %179 = arith.mulf %178, %171 : vector<32x64xf32>
    %cst_84 = arith.constant -0.284496725 : f32
    %180 = vector.broadcast %cst_84 : f32 to vector<32x64xf32>
    %181 = arith.addf %179, %180 : vector<32x64xf32>
    %182 = arith.mulf %181, %171 : vector<32x64xf32>
    %cst_85 = arith.constant 0.254829586 : f32
    %183 = vector.broadcast %cst_85 : f32 to vector<32x64xf32>
    %184 = arith.addf %182, %183 : vector<32x64xf32>
    %185 = arith.mulf %184, %171 : vector<32x64xf32>
    %cst_86 = arith.constant 0.000000e+00 : f32
    %186 = vector.broadcast %cst_86 : f32 to vector<32x64xf32>
    %187 = arith.subf %186, %165 : vector<32x64xf32>
    %188 = arith.mulf %187, %165 : vector<32x64xf32>
    %189 = math.exp %188 : vector<32x64xf32>
    %190 = arith.mulf %185, %189 : vector<32x64xf32>
    %cst_87 = arith.constant 1.000000e+00 : f32
    %191 = vector.broadcast %cst_87 : f32 to vector<32x64xf32>
    %192 = arith.subf %191, %190 : vector<32x64xf32>
    %193 = arith.mulf %164, %192 : vector<32x64xf32>
    %cst_88 = arith.constant 1.000000e+00 : f32
    %194 = vector.broadcast %cst_88 : f32 to vector<32x64xf32>
    %195 = arith.addf %194, %193 : vector<32x64xf32>
    %196 = arith.mulf %157, %195 : vector<32x64xf32>
    %c0_89 = arith.constant 0 : index
    %c0_90 = arith.constant 0 : index
    %c0_91 = arith.constant 0 : index
    %197 = vector.load %arg16[%c0_89, %c0_90, %c0_91] : memref<1x64x32xf32, #tpu.memory_space<vmem>>, vector<1x64x32xf32>
    %198 = vector.shape_cast %197 : vector<1x64x32xf32> to vector<64x32xf32>
    %cst_92 = arith.constant dense<0.000000e+00> : vector<32x32xf32>
    %199 = tpu.matmul %196, %198, %cst_92 {dimension_numbers = #tpu.dot_dimension_numbers<[1], [0], [0], [1], [0, 0, 1, 1], [], []>} : vector<32x64xf32>, vector<64x32xf32>, vector<32x32xf32> -> vector<32x32xf32>
    %c0_93 = arith.constant 0 : index
    %c0_94 = arith.constant 0 : index
    %c0_95 = arith.constant 0 : index
    %200 = vector.load %arg17[%c0_93, %c0_94, %c0_95] : memref<1x1x32xf32, #tpu.memory_space<vmem>>, vector<1x1x32xf32>
    %201 = vector.shape_cast %200 : vector<1x1x32xf32> to vector<1x32xf32>
    %202 = vector.broadcast %201 : vector<1x32xf32> to vector<32x32xf32>
    %203 = arith.addf %199, %202 : vector<32x32xf32>
    %204 = arith.addf %122, %203 : vector<32x32xf32>
    %c0_96 = arith.constant 0 : index
    %c0_97 = arith.constant 0 : index
    %205 = vector.load %arg21[%c0_96, %c0_97] : memref<32x32xf32, #tpu.memory_space<vmem>>, vector<32x32xf32>
    tpu.vector_store %arg21[%c0_96, %c0_97], %204 {strides = array<i32>} : memref<32x32xf32, #tpu.memory_space<vmem>>, vector<32x32xf32>,
    %c1_i32 = arith.constant 1 : i32
    %206 = arith.cmpi eq, %arg0, %c1_i32 : i32
    %207 = arith.extui %206 : i1 to i32
    %c0_i32_98 = arith.constant 0 : i32
    %208 = arith.cmpi ne, %207, %c0_i32_98 : i32
    scf.if %208 {
      %c0_99 = arith.constant 0 : index
      %c0_100 = arith.constant 0 : index
      %209 = vector.load %arg18[%c0_99, %c0_100] : memref<1x32xf32, #tpu.memory_space<vmem>>, vector<1x32xf32>
      %c0_101 = arith.constant 0 : index
      %c0_102 = arith.constant 0 : index
      %210 = vector.load %arg19[%c0_101, %c0_102] : memref<1x32xf32, #tpu.memory_space<vmem>>, vector<1x32xf32>
      %cst_103 = arith.constant dense<0.000000e+00> : vector<32xf32>
      %211 = vector.multi_reduction <add>, %204, %cst_103 [1] : vector<32x32xf32> to vector<32xf32>
      %212 = vector.shape_cast %211 : vector<32xf32> to vector<32x1xf32>
      %cst_104 = arith.constant 3.200000e+01 : f32
      %213 = vector.broadcast %cst_104 : f32 to vector<32x1xf32>
      %214 = arith.divf %212, %213 : vector<32x1xf32>
      %215 = vector.broadcast %214 : vector<32x1xf32> to vector<32x32xf32>
      %216 = arith.subf %204, %215 : vector<32x32xf32>
      %217 = arith.mulf %216, %216 : vector<32x32xf32>
      %cst_105 = arith.constant dense<0.000000e+00> : vector<32xf32>
      %218 = vector.multi_reduction <add>, %217, %cst_105 [1] : vector<32x32xf32> to vector<32xf32>
      %219 = vector.shape_cast %218 : vector<32xf32> to vector<32x1xf32>
      %cst_106 = arith.constant 3.200000e+01 : f32
      %220 = vector.broadcast %cst_106 : f32 to vector<32x1xf32>
      %221 = arith.divf %219, %220 : vector<32x1xf32>
      %222 = vector.broadcast %214 : vector<32x1xf32> to vector<32x32xf32>
      %223 = arith.subf %204, %222 : vector<32x32xf32>
      %cst_107 = arith.constant 9.99999974E-6 : f32
      %224 = vector.broadcast %cst_107 : f32 to vector<32x1xf32>
      %225 = arith.addf %221, %224 : vector<32x1xf32>
      %226 = math.rsqrt %225 : vector<32x1xf32>
      %227 = vector.broadcast %226 : vector<32x1xf32> to vector<32x32xf32>
      %228 = arith.mulf %223, %227 : vector<32x32xf32>
      %229 = vector.broadcast %209 : vector<1x32xf32> to vector<32x32xf32>
      %230 = arith.mulf %228, %229 : vector<32x32xf32>
      %231 = vector.broadcast %210 : vector<1x32xf32> to vector<32x32xf32>
      %232 = arith.addf %230, %231 : vector<32x32xf32>
      %c0_108 = arith.constant 0 : index
      %c0_109 = arith.constant 0 : index
      %233 = vector.load %arg20[%c0_108, %c0_109] : memref<32x32xf32, #tpu.memory_space<vmem>>, vector<32x32xf32>
      tpu.vector_store %arg20[%c0_108, %c0_109], %232 {strides = array<i32>} : memref<32x32xf32, #tpu.memory_space<vmem>>, vector<32x32xf32>,
    } else {
    }
    return
  }
  func.func @transform_0(%arg0: i32) -> (i32, i32) {
    %c0_i32 = arith.constant 0 : i32
    %c0_i32_0 = arith.constant 0 : i32
    %c0_i32_1 = arith.constant 0 : i32
    return %c0_i32, %c0_i32_0 : i32, i32
  }
  func.func @transform_1(%arg0: i32) -> (i32, i32) {
    %c0_i32 = arith.constant 0 : i32
    %c0_i32_0 = arith.constant 0 : i32
    %c0_i32_1 = arith.constant 0 : i32
    return %c0_i32, %c0_i32_0 : i32, i32
  }
  func.func @transform_2(%arg0: i32) -> (i32, i32) {
    %c0_i32 = arith.constant 0 : i32
    %c0_i32_0 = arith.constant 0 : i32
    %c0_i32_1 = arith.constant 0 : i32
    return %c0_i32, %c0_i32_0 : i32, i32
  }
  func.func @transform_3(%arg0: i32) -> (i32, i32) {
    %c0_i32 = arith.constant 0 : i32
    %c0_i32_0 = arith.constant 0 : i32
    %c0_i32_1 = arith.constant 0 : i32
    return %c0_i32, %c0_i32_0 : i32, i32
  }
  func.func @transform_4(%arg0: i32) -> (i32, i32) {
    %c0_i32 = arith.constant 0 : i32
    %c0_i32_0 = arith.constant 0 : i32
    %c0_i32_1 = arith.constant 0 : i32
    return %c0_i32, %c0_i32_0 : i32, i32
  }
  func.func @transform_5(%arg0: i32) -> (i32, i32, i32) {
    %c0_i32 = arith.constant 0 : i32
    %c0_i32_0 = arith.constant 0 : i32
    %c0_i32_1 = arith.constant 0 : i32
    return %arg0, %c0_i32, %c0_i32_0 : i32, i32, i32
  }
  func.func @transform_6(%arg0: i32) -> (i32, i32, i32) {
    %c0_i32 = arith.constant 0 : i32
    %c0_i32_0 = arith.constant 0 : i32
    %c0_i32_1 = arith.constant 0 : i32
    return %arg0, %c0_i32, %c0_i32_0 : i32, i32, i32
  }
  func.func @transform_7(%arg0: i32) -> (i32, i32, i32) {
    %c0_i32 = arith.constant 0 : i32
    %c0_i32_0 = arith.constant 0 : i32
    %c0_i32_1 = arith.constant 0 : i32
    return %arg0, %c0_i32, %c0_i32_0 : i32, i32, i32
  }
  func.func @transform_8(%arg0: i32) -> (i32, i32, i32) {
    %c0_i32 = arith.constant 0 : i32
    %c0_i32_0 = arith.constant 0 : i32
    %c0_i32_1 = arith.constant 0 : i32
    return %arg0, %c0_i32, %c0_i32_0 : i32, i32, i32
  }
  func.func @transform_9(%arg0: i32) -> (i32, i32, i32) {
    %c0_i32 = arith.constant 0 : i32
    %c0_i32_0 = arith.constant 0 : i32
    %c0_i32_1 = arith.constant 0 : i32
    return %arg0, %c0_i32, %c0_i32_0 : i32, i32, i32
  }
  func.func @transform_10(%arg0: i32) -> (i32, i32, i32) {
    %c0_i32 = arith.constant 0 : i32
    %c0_i32_0 = arith.constant 0 : i32
    %c0_i32_1 = arith.constant 0 : i32
    return %arg0, %c0_i32, %c0_i32_0 : i32, i32, i32
  }
  func.func @transform_11(%arg0: i32) -> (i32, i32, i32) {
    %c0_i32 = arith.constant 0 : i32
    %c0_i32_0 = arith.constant 0 : i32
    %c0_i32_1 = arith.constant 0 : i32
    return %arg0, %c0_i32, %c0_i32_0 : i32, i32, i32
  }
  func.func @transform_12(%arg0: i32) -> (i32, i32, i32) {
    %c0_i32 = arith.constant 0 : i32
    %c0_i32_0 = arith.constant 0 : i32
    %c0_i32_1 = arith.constant 0 : i32
    return %arg0, %c0_i32, %c0_i32_0 : i32, i32, i32
  }
  func.func @transform_13(%arg0: i32) -> (i32, i32, i32) {
    %c0_i32 = arith.constant 0 : i32
    %c0_i32_0 = arith.constant 0 : i32
    %c0_i32_1 = arith.constant 0 : i32
    return %arg0, %c0_i32, %c0_i32_0 : i32, i32, i32
  }
  func.func @transform_14(%arg0: i32) -> (i32, i32, i32) {
    %c0_i32 = arith.constant 0 : i32
    %c0_i32_0 = arith.constant 0 : i32
    %c0_i32_1 = arith.constant 0 : i32
    return %arg0, %c0_i32, %c0_i32_0 : i32, i32, i32
  }
  func.func @transform_15(%arg0: i32) -> (i32, i32, i32) {
    %c0_i32 = arith.constant 0 : i32
    %c0_i32_0 = arith.constant 0 : i32
    %c0_i32_1 = arith.constant 0 : i32
    return %arg0, %c0_i32, %c0_i32_0 : i32, i32, i32
  }
  func.func @transform_16(%arg0: i32) -> (i32, i32, i32) {
    %c0_i32 = arith.constant 0 : i32
    %c0_i32_0 = arith.constant 0 : i32
    %c0_i32_1 = arith.constant 0 : i32
    return %arg0, %c0_i32, %c0_i32_0 : i32, i32, i32
  }
  func.func @transform_17(%arg0: i32) -> (i32, i32) {
    %c0_i32 = arith.constant 0 : i32
    %c0_i32_0 = arith.constant 0 : i32
    %c0_i32_1 = arith.constant 0 : i32
    return %c0_i32, %c0_i32_0 : i32, i32
  }
  func.func @transform_18(%arg0: i32) -> (i32, i32) {
    %c0_i32 = arith.constant 0 : i32
    %c0_i32_0 = arith.constant 0 : i32
    %c0_i32_1 = arith.constant 0 : i32
    return %c0_i32, %c0_i32_0 : i32, i32
  }
  func.func @transform_19(%arg0: i32) -> (i32, i32) {
    %c0_i32 = arith.constant 0 : i32
    %c0_i32_0 = arith.constant 0 : i32
    %c0_i32_1 = arith.constant 0 : i32
    return %c0_i32, %c0_i32_0 : i32, i32
  }
}

</mosaic_0001>

<bundles_post_ra>
// kernel: vit_forward.1
= control target key start
LH: loop header
LB: loop body
LE: loop exit
PB: predicated region body
PF: predicated region fallthrough
CT: control target
= control target key end

     0   :  { %s3940_s0 = inlined_call_operand.vmem [shape: f32[32,64], index: 0, kind: input, shape index: {}]   ;;  %s3941_s1 = inlined_call_operand.vmem [shape: f32[64,32], index: 1, kind: input, shape index: {}]   ;;  %s3942_s2 = inlined_call_operand.vmem [shape: f32[1,32], index: 2, kind: input, shape index: {}]   ;;  %s3943_s3 = inlined_call_operand.vmem [shape: f32[32,32], index: 3, kind: input, shape index: {}]   ;;  %s3944_s4 = inlined_call_operand.vmem [shape: f32[32,32], index: 4, kind: input, shape index: {}]   ;;  %s3945_s5 = inlined_call_operand.vmem [shape: f32[2,1,32], index: 5, kind: input, shape index: {}]   ;;  %s3946_s6 = inlined_call_operand.vmem [shape: f32[2,1,32], index: 6, kind: input, shape index: {}]   ;;  %s3947_s7 = inlined_call_operand.vmem [shape: f32[2,32,96], index: 7, kind: input, shape index: {}]   ;;  %s3948_s8 = inlined_call_operand.vmem [shape: f32[2,1,96], index: 8, kind: input, shape index: {}]   ;;  %s3949_s9 = inlined_call_operand.vmem [shape: f32[2,32,32], index: 9, kind: input, shape index: {}]   ;;  %s3950_s10 = inlined_call_operand.vmem [shape: f32[2,1,32], index: 10, kind: input, shape index: {}]   ;;  %s3951_s11 = inlined_call_operand.vmem [shape: f32[2,1,32], index: 11, kind: input, shape index: {}]   ;;  %s3952_s12 = inlined_call_operand.vmem [shape: f32[2,1,32], index: 12, kind: input, shape index: {}]   ;;  %s3953_s13 = inlined_call_operand.vmem [shape: f32[2,32,64], index: 13, kind: input, shape index: {}]   ;;  %s3954_s14 = inlined_call_operand.vmem [shape: f32[2,1,64], index: 14, kind: input, shape index: {}]   ;;  %s3955_s15 = inlined_call_operand.vmem [shape: f32[2,64,32], index: 15, kind: input, shape index: {}]   ;;  %s3956_s16 = inlined_call_operand.vmem [shape: f32[2,1,32], index: 16, kind: input, shape index: {}]   ;;  %s3957_s17 = inlined_call_operand.vmem [shape: f32[1,32], index: 17, kind: input, shape index: {}]   ;;  %s3958_s18 = inlined_call_operand.vmem [shape: f32[1,32], index: 18, kind: input, shape index: {}]   ;;  %s3959_s19 = inlined_call_operand.hbm [shape: f32[32,32], index: 19, kind: output, shape index: {}]  }
   0x1   :  { %3965 = sst [smem:[#allocation9_spill]] %s3940_s0 }
   0x2   :  { %3966 = sst [smem:[#allocation10_spill]] %s3941_s1 }
   0x3   :  { %3967 = sst [smem:[#allocation11_spill]] %s3942_s2 }
   0x4   :  { %3968 = sst [smem:[#allocation12_spill]] %s3943_s3 }
   0x5   :  { %3969 = sst [smem:[#allocation13_spill]] %s3947_s7 }
   0x6   :  { %3970 = sst [smem:[#allocation14_spill]] %s3949_s9 }
   0x7   :  { %3971 = sst [smem:[#allocation15_spill]] %s3957_s17 }
   0x8   :  { %3972 = sst [smem:[#allocation16_spill]] %s3958_s18 }
   0x9   :  { %3973 = sst [smem:[#allocation17_spill]] %s3959_s19 }
   0xa   :  { %24 = vsyncpa [#allocation5], 0  ;;  %s3108_s0 = smov 0  }
   0xb LB: > { %3974 = sst [smem:[#allocation7_spill]] %s2988_s0  ;;  %s3114_s30 = sadd.s32 4294967295, %s2988_s0   ;;  %s2988_s0 = sphi %s3108_s0, %s30_s0  }
   0xc   : > { %p2646_p0 = scmp.ge.s32.totalorder %s2988_s0, 1  ;;  %p627_p1 = scmp.lt.s32.totalorder %s2988_s0, 3 }
   0xe   : > { %p628_p2 = pnand %p2646_p0, %p627_p1 }
  0x10   : > { %631 = sbr.rel (%p628_p2) target bundleno = 2973 (0xb9d), region = 96 }
  0x15   : > { %p717_p3 = scmp.lt.s32.totalorder %s3114_s30, 1  ;;  %s3975_s7 = sld [smem:[#allocation13_spill]] }
  0x16   : > { %s3976_s9 = sld [smem:[#allocation14_spill]]  ;;  %p2655_p4 = scmp.ne.s32.totalorder %s3114_s30, 0 }
  0x17   : > { %s3120_s20 = scalar_select %p717_p3, %s3114_s30, 1 }
  0x18   : > { %s3978_s28 = sld [smem:[#allocation10_spill]] (!%p2655_p4) }
  0x19   : > { %s2729_s25 = sshll.u32 %s3120_s20, 5  ;;  %s741_s17 = scalar_lea.vmem %s3951_s11, %s3120_s20 }
  0x1a   : > { %s744_s27 = scalar_lea.vmem %s3952_s12, %s3120_s20  ;;  %764 = sbr.rel (%p2655_p4) target bundleno = 185 (0xb9), region = 100 }
  0x1b   : > { %s3138_s21 = scalar_lea.vmem %s3975_s7, %s2729_s25  ;;  %s3160_s7 = scalar_lea.vmem %s3953_s13, %s2729_s25 }
  0x1c   : > { %s3143_s19 = scalar_lea.vmem %s3976_s9, %s2729_s25  ;;  %s752_s9 = scalar_lea.vmem %s3954_s14, %s3120_s20 }
  0x1d   : > { %3977 = sst [smem:[#allocation8_spill]] %s3143_s19  ;;  %s2732_s19 = sshll.u32 %s3120_s20, 6 }
  0x1e   : > { %s3170_s2 = scalar_lea.vmem %s3955_s15, %s2732_s19  ;;  %s3979_s24 = sld [smem:[#allocation9_spill]] (!%p2655_p4) }
  0x1f   : > { %v776_v0 = vld [vmem:[%s3978_s28 + $0x38] sm:$0xff]  ;;  %v775_v1 = vld [vmem:[%s3978_s28 + $0x30] sm:$0xff]  ;;  %v774_v2 = vld [vmem:[%s3978_s28 + $0x28] sm:$0xff]  ;;  %vm781_vm0 = vcmask 523264   ;;  %s3980_s22 = sld [smem:[#allocation11_spill]]  ;;  %vm831_vm1 = vcmask 261120  }
  0x20   : > { %2734 = vmatpush.msra.mxu2 %v776_v0  ;;  %2735 = vmatpush.msra.mxu3 %v776_v0  ;;  %v773_v3 = vld [vmem:[%s3978_s28 + $0x20] sm:$0xff]  ;;  %v772_v4 = vld [vmem:[%s3978_s28 + $0x18] sm:$0xff]  ;;  %v771_v5 = vld [vmem:[%s3978_s28 + $0x10] sm:$0xff]  ;;  %s3981_s3 = sld [smem:[#allocation12_spill]] }
  0x21   : > { %802 = vmatpush.msra.mxu0 %v776_v0  ;;  %2733 = vmatpush.msra.mxu1 %v776_v0  ;;  %v770_v6 = vld [vmem:[%s3978_s28 + $0x8] sm:$0xff]  ;;  %v769_v7 = vld [vmem:[%s3978_s28] sm:$0xff] }
  0x22   : > { %2737 = vmatpush.msra.mxu2 %v775_v1  ;;  %2738 = vmatpush.msra.mxu3 %v775_v1 }
  0x23   : > { %803 = vmatpush.msra.mxu0 %v775_v1  ;;  %2736 = vmatpush.msra.mxu1 %v775_v1 }
  0x24   : > { %2740 = vmatpush.msra.mxu2 %v774_v2  ;;  %2741 = vmatpush.msra.mxu3 %v774_v2  ;;  %v767_v8 = vld [vmem:[%s3979_s24 + $0x10] sm:$0xff]  ;;  %v768_v9 = vld [vmem:[%s3979_s24 + $0x18] sm:$0xff]  ;;  %v765_v10 = vld [vmem:[%s3979_s24] sm:$0xff] }
  0x25   : > { %804 = vmatpush.msra.mxu0 %v774_v2  ;;  %2739 = vmatpush.msra.mxu1 %v774_v2  ;;  %v766_v11 = vld [vmem:[%s3979_s24 + $0x8] sm:$0xff]  ;;  %v2789_v12 = vld [vmem:[%s3980_s22] ss:$0 sm:$0xff] }
  0x26   : > { %2743 = vmatpush.msra.mxu2 %v773_v3  ;;  %2744 = vmatpush.msra.mxu3 %v773_v3  ;;  %v823_v14 = vld [vmem:[%s3981_s3] sm:$0xff]  ;;  %v824_v16 = vld [vmem:[%s3981_s3 + $0x8] sm:$0xff]  ;;  %v825_v22 = vld [vmem:[%s3981_s3 + $0x10] sm:$0xff] }
  0x27   : > { %805 = vmatpush.msra.mxu0 %v773_v3  ;;  %2742 = vmatpush.msra.mxu1 %v773_v3  ;;  %v826_v24 = vld [vmem:[%s3981_s3 + $0x18] sm:$0xff] }
  0x28   : > { %2746 = vmatpush.msra.mxu2 %v772_v4  ;;  %2747 = vmatpush.msra.mxu3 %v772_v4 }
  0x29   : > { %806 = vmatpush.msra.mxu0 %v772_v4  ;;  %2745 = vmatpush.msra.mxu1 %v772_v4 }
  0x2a   : > { %2749 = vmatpush.msra.mxu2 %v771_v5  ;;  %2750 = vmatpush.msra.mxu3 %v771_v5 }
  0x2b   : > { %807 = vmatpush.msra.mxu0 %v771_v5  ;;  %2748 = vmatpush.msra.mxu1 %v771_v5 }
  0x2c   : > { %2752 = vmatpush.msra.mxu2 %v770_v6  ;;  %2753 = vmatpush.msra.mxu3 %v770_v6 }
  0x2d   : > { %808 = vmatpush.msra.mxu0 %v770_v6  ;;  %2751 = vmatpush.msra.mxu1 %v770_v6 }
  0x2e   : > { %2755 = vmatpush.msra.mxu2 %v769_v7  ;;  %2756 = vmatpush.msra.mxu3 %v769_v7 }
  0x2f   : > { %2658 = vmatmul.msk.f32.vlgmr.msra.gmra.mxu2 %vm781_vm0, %v767_v8  ;;  %2659 = vmatmul.msk.f32.vlgmr.msra.gmra.mxu3 %vm781_vm0, %v768_v9 }
  0x30   : > { %809 = vmatpush.msra.mxu0 %v769_v7  ;;  %2754 = vmatpush.msra.mxu1 %v769_v7 }
  0x31   : > { %2656 = vmatmul.msk.f32.vlgmr.msra.gmra.mxu0 %vm781_vm0, %v765_v10  ;;  %2657 = vmatmul.msk.f32.vlgmr.msra.gmra.mxu1 %vm781_vm0, %v766_v11 }
  0xae   : > { %v811_v13 = vpop.f32.mrf.mxu0  ;;  %v814_v15 = vpop.f32.mrf.mxu1 }
  0xaf   : > { %v812_v17 = vadd.f32 %v2789_v12, %v811_v13  ;;  %v815_v18 = vadd.f32 %v2789_v12, %v814_v15 }
  0xb1   : > { %v827_v19 = vadd.f32 %v823_v14, %v812_v17  ;;  %v828_v20 = vadd.f32 %v824_v16, %v815_v18 }
  0xb2   : > { %v817_v21 = vpop.f32.mrf.mxu2  ;;  %v820_v23 = vpop.f32.mrf.mxu3 }
  0xb3   : > { %832 = vst.msk [vmem:[#allocation2] sm:$0xff] %vm831_vm1, %v827_v19  ;;  %v818_v25 = vadd.f32 %v2789_v12, %v817_v21  ;;  %v821_v26 = vadd.f32 %v2789_v12, %v820_v23 }
  0xb4   : > { %833 = vst.msk [vmem:[#allocation2 + $0x8] sm:$0xff] %vm831_vm1, %v828_v20 }
  0xb5   : > { %v829_v27 = vadd.f32 %v825_v22, %v818_v25  ;;  %v830_v28 = vadd.f32 %v826_v24, %v821_v26 }
  0xb7   : > { %834 = vst.msk [vmem:[#allocation2 + $0x10] sm:$0xff] %vm831_vm1, %v829_v27 }
  0xb8   : > { %835 = vst.msk [vmem:[#allocation2 + $0x18] sm:$0xff] %vm831_vm1, %v830_v28 }
  0xb9 PF: > { %vm842_vm2 = vcmask 261120   ;;  %v2990_v37 = vmov 32.0   ;;  %v955_v0 = vld [vmem:[%s3138_s21 + $0x18] sm:$0xff]  ;;  %v954_v1 = vld [vmem:[%s3138_s21 + $0x10] sm:$0xff]  ;;  %v953_v2 = vld [vmem:[%s3138_s21 + $0x8] sm:$0xff]  ;;  %s3982_s23 = scalar_lea.vmem %s3945_s5, %s3120_s20  ;;  %s3983_s29 = scalar_lea.vmem %s3946_s6, %s3120_s20  ;;  %vm1017_vm0 = vcmask 64512  }
  0xba   : > { %v836_v30 = vld [vmem:[#allocation2] sm:$0xff]  ;;  %2838 = vrcp.f32 %v2990_v37  ;;  %984 = vmatpush.msra.mxu0 %v955_v0  ;;  %s3984_s19 = scalar_lea.vmem %s3948_s8, %s3120_s20  ;;  %s2991_s18 = smov 96  }
  0xbb   : > { %v843_v32 = vsel %vm842_vm2, %v836_v30, 0.0  ;;  %v837_v34 = vld [vmem:[#allocation2 + $0x8] sm:$0xff]  ;;  %v952_v3 = vld [vmem:[%s3138_s21] sm:$0xff]  ;;  %s2992_s21 = smov 88   ;;  %s2993_s22 = smov 64  }
  0xbc   : > { %844 = vadd.xlane.f32.xlu0 %v843_v32  ;;  %v846_v36 = vsel %vm842_vm2, %v837_v34, 0.0  ;;  %985 = vmatpush.msra.mxu0 %v954_v1  ;;  %s2995_s26 = smov 80   ;;  %s2996_s25 = smov 72  }
  0xbd   : > { %s2998_s0 = smov 104   ;;  %s3001_s1 = smov 48  }
  0xbe   : > { %v838_v29 = vld [vmem:[#allocation2 + $0x10] sm:$0xff]  ;;  %986 = vmatpush.msra.mxu0 %v953_v2  ;;  %p2724_p5 = scmp.ne.s32.totalorder %s3114_s30, 1 }
  0xbf   : > { %v849_v31 = vsel %vm842_vm2, %v838_v29, 0.0  ;;  %v839_v33 = vld [vmem:[#allocation2 + $0x18] sm:$0xff] }
  0xc0   : > { %850 = vadd.xlane.f32.xlu1 %v849_v31  ;;  %v852_v35 = vsel %vm842_vm2, %v839_v33, 0.0  ;;  %v2839_v38 = vpop.eup %2838  ;;  %987 = vmatpush.msra.mxu0 %v952_v3 }
  0xc1   : > { %v856_v39 = vmul.f32 32.0, %v2839_v38  ;;  %vm860_vm3 = vweird.f32 %v2839_v38 }
  0xc3   : > { %v857_v40 = vsub.f32 1.0, %v856_v39 }
  0xc4   : > { %847 = vadd.xlane.f32.xlu0 %v846_v36 }
  0xc5   : > { %v858_v41 = vmul.f32 %v2839_v38, %v857_v40 }
  0xc7   : > { %v859_v42 = vadd.f32 %v2839_v38, %v858_v41 }
  0xc8   : > { %853 = vadd.xlane.f32.xlu1 %v852_v35 }
  0xc9   : > { %v3232_v43 = vsel %vm860_vm3, %v2839_v38, %v859_v42 }
 0x12f   : > { %v845_v45 = vpop.xlane.xlu0 %844 }
 0x130   : > { %v862_v47 = vmul.f32 %v3232_v43, %v845_v45 }
 0x132   : > { %v3238_v49 = vsub.f32 %v836_v30, %v862_v47  ;;  %v2830_v30 = vld [vmem:[%s3982_s23] ss:$0 sm:$0xff]  ;;  %s2994_s23 = smov 120  }
 0x133   : > { %v851_v44 = vpop.xlane.xlu1 %850 }
 0x134   : > { %v864_v46 = vmul.f32 %v3232_v43, %v851_v44  ;;  %v870_v51 = vmul.f32 %v3238_v49, %v3238_v49 }
 0x136   : > { %v3236_v48 = vsub.f32 %v838_v29, %v864_v46  ;;  %v874_v53 = vsel %vm842_vm2, %v870_v51, 0.0 }
 0x137   : > { %875 = vadd.xlane.f32.xlu2 %v874_v53  ;;  %v848_v55 = vpop.xlane.xlu0 %847 }
 0x138   : > { %v872_v50 = vmul.f32 %v3236_v48, %v3236_v48  ;;  %v863_v57 = vmul.f32 %v3232_v43, %v848_v55 }
 0x13a   : > { %v880_v52 = vsel %vm842_vm2, %v872_v50, 0.0  ;;  %v3250_v59 = vsub.f32 %v837_v34, %v863_v57  ;;  %v2831_v34 = vld [vmem:[%s3983_s29] ss:$0 sm:$0xff] }
 0x13b   : > { %v854_v54 = vpop.xlane.xlu1 %853  ;;  %881 = vadd.xlane.f32.xlu0 %v880_v52 }
 0x13c   : > { %v865_v56 = vmul.f32 %v3232_v43, %v854_v54  ;;  %v871_v61 = vmul.f32 %v3250_v59, %v3250_v59 }
 0x13e   : > { %v3248_v58 = vsub.f32 %v839_v33, %v865_v56  ;;  %v877_v63 = vsel %vm842_vm2, %v871_v61, 0.0 }
 0x13f   : > { %878 = vadd.xlane.f32.xlu2 %v877_v63 }
 0x140   : > { %v873_v60 = vmul.f32 %v3248_v58, %v3248_v58 }
 0x142   : > { %v883_v62 = vsel %vm842_vm2, %v873_v60, 0.0 }
 0x143   : > { %884 = vadd.xlane.f32.xlu1 %v883_v62 }
 0x1aa   : > { %v876_v4 = vpop.xlane.xlu2 %875 }
 0x1ab   : > { %v886_v6 = vmul.f32 %v876_v4, %v3232_v43 }
 0x1ad   : > { %v890_v8 = vadd.f32 1e-06, %v886_v6 }
 0x1ae   : > { %v882_v5 = vpop.xlane.xlu0 %881 }
 0x1af   : > { %v888_v7 = vmul.f32 %v882_v5, %v3232_v43  ;;  %2840 = vrsqrt.f32 %v890_v8  ;;  %vm900_vm5 = vweird.f32 %v890_v8 }
 0x1b1   : > { %v892_v9 = vadd.f32 1e-06, %v888_v7 }
 0x1b2   : > { %v879_v11 = vpop.xlane.xlu2 %878 }
 0x1b3   : > { %2842 = vrsqrt.f32 %v892_v9  ;;  %v887_v13 = vmul.f32 %v879_v11, %v3232_v43  ;;  %vm920_vm7 = vweird.f32 %v892_v9 }
 0x1b5   : > { %v2841_v14 = vpop.eup %2840  ;;  %v891_v16 = vadd.f32 1e-06, %v887_v13 }
 0x1b6   : > { %v885_v10 = vpop.xlane.xlu1 %884  ;;  %v895_v18 = vmul.f32 %v2841_v14, %v890_v8  ;;  %vm901_vm4 = vweird.f32 %v2841_v14 }
 0x1b7   : > { %v889_v12 = vmul.f32 %v885_v10, %v3232_v43  ;;  %vm902_vm6 = vmor %vm900_vm5, %vm901_vm4  ;;  %vm910_vm11 = vweird.f32 %v891_v16 }
 0x1b8   : > { %v896_v20 = vmul.f32 %v2841_v14, %v895_v18 }
 0x1b9   : > { %v893_v15 = vadd.f32 1e-06, %v889_v12  ;;  %v2843_v17 = vpop.eup %2842 }
 0x1ba   : > { %v915_v19 = vmul.f32 %v2843_v17, %v892_v9  ;;  %v897_v21 = vmul.f32 0.5, %v896_v20  ;;  %vm921_vm8 = vweird.f32 %v2843_v17 }
 0x1bb   : > { %2844 = vrsqrt.f32 %v893_v15  ;;  %vm922_vm10 = vmor %vm920_vm7, %vm921_vm8  ;;  %vm930_vm13 = vweird.f32 %v893_v15 }
 0x1bc   : > { %2846 = vrsqrt.f32 %v891_v16  ;;  %v916_v22 = vmul.f32 %v2843_v17, %v915_v19  ;;  %v898_v23 = vsub.f32 1.5, %v897_v21 }
 0x1be   : > { %v899_v26 = vmul.f32 %v2841_v14, %v898_v23  ;;  %v917_v27 = vmul.f32 0.5, %v916_v22 }
 0x1c0   : > { %v903_v31 = vsel %vm902_vm6, %v2841_v14, %v899_v26  ;;  %v918_v35 = vsub.f32 1.5, %v917_v27 }
 0x1c1   : > { %v2845_v24 = vpop.eup %2844  ;;  %v934_v33 = vmul.f32 %v903_v31, %v3238_v49 }
 0x1c2   : > { %v2847_v25 = vpop.eup %2846  ;;  %v925_v28 = vmul.f32 %v2845_v24, %v893_v15  ;;  %v919_v41 = vmul.f32 %v2843_v17, %v918_v35  ;;  %vm931_vm14 = vweird.f32 %v2845_v24 }
 0x1c3   : > { %v905_v29 = vmul.f32 %v2847_v25, %v891_v16  ;;  %v941_v38 = vmul.f32 %v2830_v30, %v934_v33  ;;  %vm911_vm9 = vweird.f32 %v2847_v25  ;;  %vm932_vm15 = vmor %vm930_vm13, %vm931_vm14  ;;  %v3362_v33 = vld [vmem:[%s3944_s4 + $0x8] sm:$0xff] }
 0x1c4   : > { %v926_v36 = vmul.f32 %v2845_v24, %v925_v28  ;;  %vm912_vm12 = vmor %vm910_vm11, %vm911_vm9  ;;  %v923_v47 = vsel %vm922_vm10, %v2843_v17, %v919_v41  ;;  %v3355_v28 = vld [vmem:[%s3944_s4] sm:$0xff] }
 0x1c5   : > { %v906_v32 = vmul.f32 %v2847_v25, %v905_v29  ;;  %v948_v40 = vadd.f32 %v2831_v34, %v941_v38  ;;  %v936_v52 = vmul.f32 %v923_v47, %v3236_v48  ;;  %v2832_v48 = vld [vmem:[%s3984_s19] ss:$0 sm:$0xff]  ;;  %v3369_v38 = vld [vmem:[%s3944_s4 + $0x10] sm:$0xff]  ;;  %s3002_s19 = smov 8  }
 0x1c6   : > { %v927_v42 = vmul.f32 0.5, %v926_v36 }
 0x1c7   : > { %v907_v37 = vmul.f32 0.5, %v906_v32  ;;  %2660 = vmatmul.msk.f32.vlgmr.msra.gmra.mxu0 %vm842_vm2, %v948_v40  ;;  %v943_v54 = vmul.f32 %v2830_v30, %v936_v52 }
 0x1c8   : > { %v928_v49 = vsub.f32 1.5, %v927_v42 }
 0x1c9   : > { %v908_v39 = vsub.f32 1.5, %v907_v37  ;;  %v950_v56 = vadd.f32 %v2831_v34, %v943_v54 }
 0x1ca   : > { %v929_v53 = vmul.f32 %v2845_v24, %v928_v49 }
 0x1cb   : > { %v909_v44 = vmul.f32 %v2847_v25, %v908_v39 }
 0x1cc   : > { %v933_v55 = vsel %vm932_vm15, %v2845_v24, %v929_v53 }
 0x1cd   : > { %v913_v45 = vsel %vm912_vm12, %v2847_v25, %v909_v44  ;;  %v937_v57 = vmul.f32 %v933_v55, %v3248_v58 }
 0x1ce   : > { %v935_v46 = vmul.f32 %v913_v45, %v3250_v59  ;;  %v3380_v45 = vld [vmem:[%s3944_s4 + $0x18] sm:$0xff] }
 0x1cf   : > { %v944_v59 = vmul.f32 %v2830_v30, %v937_v57 }
 0x1d0   : > { %v942_v50 = vmul.f32 %v2830_v30, %v935_v46 }
 0x1d1   : > { %v951_v60 = vadd.f32 %v2831_v34, %v944_v59 }
 0x1d2   : > { %v949_v51 = vadd.f32 %v2831_v34, %v942_v50 }
 0x1d4   : > { %2661 = vmatmul.msk.f32.gmra.mxu0 %vm842_vm2, %v949_v51 }
 0x1dc   : > { %2662 = vmatmul.msk.f32.gmra.mxu0 %vm842_vm2, %v950_v56 }
 0x1e4   : > { %2663 = vmatmul.msk.f32.gmra.mxu0 %vm842_vm2, %v951_v60 }
 0x244   : > { %v989_v61 = vpop.f32.mrf.mxu0 }
 0x245   : > { %v3296_v1 = vadd.f32 %v2832_v48, %v989_v61 }
 0x251   : > { %v992_v62 = vpop.f32.mrf.mxu0 }
 0x252   : > { %v3289_v63 = vadd.f32 %v2832_v48, %v992_v62 }
 0x254   : > { %1011 = vrot.lane.b32.xlu1 %v3289_v63, %s2991_s18  ;;  %v3302_v4 = vpack.i.bf16 %v3296_v1, %v3289_v63 }
 0x259   : > { %v995_v0 = vpop.f32.mrf.mxu0 }
 0x25a   : > { %v3292_v58 = vadd.f32 %v2832_v48, %v995_v0 }
 0x25c   : > { %1234 = vrot.lane.b32.xlu1 %v3289_v63, %s2992_s21  ;;  %1013 = vrot.lane.b32.xlu0 %v3292_v58, %s2991_s18 }
 0x261   : > { %v998_v2 = vpop.f32.mrf.mxu0 }
 0x262   : > { %v3298_v3 = vadd.f32 %v2832_v48, %v998_v2 }
 0x264   : > { %1232 = vrot.lane.b32.xlu1 %v3296_v1, %s2992_s21  ;;  %1015 = vrot.lane.b32.xlu2 %v3298_v3, %s2991_s18  ;;  %v3322_v5 = vpack.i.bf16 %v3292_v58, %v3298_v3 }
 0x265   : > { %2791 = vrot.lane.b32.xlu0 %v3302_v4, %s2993_s22 }
 0x26c   : > { %1238 = vrot.lane.b32.xlu1 %v3298_v3, %s2992_s21  ;;  %1009 = vrot.lane.b32.xlu2 %v3296_v1, %s2991_s18  ;;  %s3003_s18 = smov 24  }
 0x26d   : > { %1224 = vrot.lane.b32.xlu0 %v3296_v1, %s2994_s23 }
 0x274   : > { %1236 = vrot.lane.b32.xlu2 %v3292_v58, %s2992_s21  ;;  %s3993_s21 = sld [smem:[#allocation8_spill]] }
 0x275   : > { %1226 = vrot.lane.b32.xlu0 %v3289_v63, %s2994_s23 }
 0x27c   : > { %1475 = vrot.lane.b32.xlu2 %v3292_v58, %s2995_s26 }
 0x27d   : > { %1228 = vrot.lane.b32.xlu0 %v3292_v58, %s2994_s23 }
 0x285   : > { %1714 = vrot.lane.b32.xlu0 %v3292_v58, %s2996_s25 }
 0x28d   : > { %2796 = vrot.lane.b32.xlu0 %v3322_v5, %s2993_s22  ;;  %s3004_s22 = smov 16  }
 0x295   : > { %1477 = vrot.lane.b32.xlu0 %v3298_v3, %s2995_s26 }
 0x29d   : > { %1716 = vrot.lane.b32.xlu0 %v3298_v3, %s2996_s25 }
 0x2be   : > { %v1016_v6 = vpop.permute.xlu2 %1015 }
 0x2bf   : > { %2664 = vmatpush.xpose.msk.msra.mxu1 %vm1017_vm0, %v1016_v6 }
 0x2c6   : > { %v1012_v7 = vpop.permute.xlu1 %1011  ;;  %v1010_v11 = vpop.permute.xlu2 %1009 }
 0x2ce   : > { %v1235_v8 = vpop.permute.xlu1 %1234  ;;  %v1014_v9 = vpop.permute.xlu0 %1013 }
 0x2cf   : > { %2665 = vmatpush.xpose.msk.msra.mxu1 %vm1017_vm0, %v1014_v9  ;;  %v1237_v15 = vpop.permute.xlu2 %1236 }
 0x2d3   : > { %2666 = vmatpush.xpose.msk.msra.mxu1 %vm1017_vm0, %v1012_v7 }
 0x2d6   : > { %v1233_v10 = vpop.permute.xlu1 %1232 }
 0x2d7   : > { %v2792_v12 = vpop.permute.xlu0 %2791  ;;  %2667 = vmatpush.xpose.msk.msra.mxu1 %vm1017_vm0, %v1010_v11  ;;  %v1476_v25 = vpop.permute.xlu2 %1475 }
 0x2d8   : > { %v2793_v22 = vunpack.i.l.bf16 %v2792_v12  ;;  %v2794_v23 = vunpack.i.h.bf16 %v2792_v12 }
 0x2da   : > { %2668 = vmatmul.msk.f32.vlgmr.msra.gmra.mxu1 %vm1017_vm0, %v3296_v1 }
 0x2de   : > { %v1239_v13 = vpop.permute.xlu1 %1238 }
 0x2df   : > { %v1225_v14 = vpop.permute.xlu0 %1224  ;;  %2676 = vmatpush.xpose.msk.msra.mxu3 %vm1017_vm0, %v1239_v13 }
 0x2e2   : > { %2669 = vmatmul.msk.f32.gmra.mxu1 %vm1017_vm0, %v3289_v63 }
 0x2e3   : > { %2677 = vmatpush.xpose.msk.msra.mxu3 %vm1017_vm0, %v1237_v15 }
 0x2e7   : > { %v1227_v16 = vpop.permute.xlu0 %1226  ;;  %2678 = vmatpush.xpose.msk.msra.mxu3 %vm1017_vm0, %v1235_v8 }
 0x2ea   : > { %2670 = vmatmul.msk.f32.gmra.mxu1 %vm1017_vm0, %v3292_v58 }
 0x2eb   : > { %2679 = vmatpush.xpose.msk.msra.mxu3 %vm1017_vm0, %v1233_v10 }
 0x2ee   : > { %2680 = vmatmul.msk.f32.vlgmr.msra.gmra.mxu3 %vm1017_vm0, %v1225_v14 }
 0x2ef   : > { %v1229_v17 = vpop.permute.xlu0 %1228 }
 0x2f2   : > { %2671 = vmatmul.msk.f32.gmra.mxu1 %vm1017_vm0, %v3298_v3 }
 0x2f6   : > { %2681 = vmatmul.msk.f32.gmra.mxu3 %vm1017_vm0, %v1227_v16 }
 0x2f7   : > { %v1715_v18 = vpop.permute.xlu0 %1714 }
 0x2fe   : > { %2682 = vmatmul.msk.f32.gmra.mxu3 %vm1017_vm0, %v1229_v17 }
 0x2ff   : > { %v2797_v19 = vpop.permute.xlu0 %2796 }
 0x300   : > { %v2798_v20 = vunpack.i.l.bf16 %v2797_v19  ;;  %v2799_v21 = vunpack.i.h.bf16 %v2797_v19 }
 0x302   : > { %1203 = vmatpush.msra.mxu2 %v2798_v20 }
 0x304   : > { %1204 = vmatpush.msra.mxu2 %v2799_v21 }
 0x306   : > { %1205 = vmatpush.msra.mxu2 %v2793_v22 }
 0x307   : > { %v1478_v24 = vpop.permute.xlu0 %1477 }
 0x308   : > { %1206 = vmatpush.msra.mxu2 %v2794_v23 }
 0x30a   : > { %2688 = vmatpush.xpose.msk.msrb.mxu2 %vm1017_vm0, %v1478_v24 }
 0x30e   : > { %2689 = vmatpush.xpose.msk.msrb.mxu2 %vm1017_vm0, %v1476_v25 }
 0x30f   : > { %v1717_v26 = vpop.permute.xlu0 %1716 }
 0x310   : > { %2700 = vmatpush.xpose.msk.msrb.mxu3 %vm1017_vm0, %v1717_v26 }
 0x314   : > { %2701 = vmatpush.xpose.msk.msrb.mxu3 %vm1017_vm0, %v1715_v18 }
 0x357   : > { %v1051_v27 = vpop.f32.mrf.mxu1 }
 0x358   : > { %v1063_v29 = vmul.f32 0.35355338, %v1051_v27 }
 0x35a   : > { %v1067_v30 = vadd.f32 %v1063_v29, %v3355_v28 }
 0x35c   : > { %v1071_v31 = vsel %vm842_vm2, %v1067_v30, -inf }
 0x35d   : > { %1072 = vmax.xlane.f32.xlu0 %v1071_v31 }
 0x35f   : > { %v1054_v32 = vpop.f32.mrf.mxu1 }
 0x360   : > { %v1064_v34 = vmul.f32 0.35355338, %v1054_v32 }
 0x362   : > { %v1068_v35 = vadd.f32 %v1064_v34, %v3362_v33 }
 0x364   : > { %v1074_v36 = vsel %vm842_vm2, %v1068_v35, -inf }
 0x365   : > { %1075 = vmax.xlane.f32.xlu2 %v1074_v36 }
 0x367   : > { %v1057_v37 = vpop.f32.mrf.mxu1 }
 0x368   : > { %v1065_v39 = vmul.f32 0.35355338, %v1057_v37 }
 0x36a   : > { %v1069_v40 = vadd.f32 %v1065_v39, %v3369_v38 }
 0x36c   : > { %v1077_v41 = vsel %vm842_vm2, %v1069_v40, -inf }
 0x36d   : > { %1078 = vmax.xlane.f32.xlu1 %v1077_v41 }
 0x36f   : > { %v1060_v42 = vpop.f32.mrf.mxu1 }
 0x370   : > { %v1066_v44 = vmul.f32 0.35355338, %v1060_v42 }
 0x371   : > { %1473 = vrot.lane.b32.xlu0 %v3289_v63, %s2995_s26  ;;  %v1273_v13 = vpop.f32.mrf.mxu3 }
 0x372   : > { %v1070_v46 = vadd.f32 %v1066_v44, %v3380_v45  ;;  %v1285_v14 = vmul.f32 0.35355338, %v1273_v13 }
 0x374   : > { %v1080_v47 = vsel %vm842_vm2, %v1070_v46, -inf  ;;  %v3412_v15 = vadd.f32 %v1285_v14, %v3355_v28 }
 0x376   : > { %v1293_v16 = vsel %vm842_vm2, %v3412_v15, -inf }
 0x379   : > { %v1276_v19 = vpop.f32.mrf.mxu3 }
 0x37a   : > { %v1286_v39 = vmul.f32 0.35355338, %v1276_v19 }
 0x386   : > { %1230 = vrot.lane.b32.xlu1 %v3298_v3, %s2994_s23  ;;  %s2997_s23 = smov 112  }
 0x39b   : > { %1081 = vmax.xlane.f32.xlu0 %v1080_v47 }
 0x3af   : > { %1712 = vrot.lane.b32.xlu0 %v3289_v63, %s2996_s25 }
 0x3d0   : > { %v1073_v49 = vpop.xlane.xlu0 %1072 }
 0x3d1   : > { %v1083_v50 = vsub.f32 %v1067_v30, %v1073_v49  ;;  %v1279_v30 = vpop.f32.mrf.mxu3  ;;  %v3430_v49 = vadd.f32 %v1286_v39, %v3362_v33 }
 0x3d2   : > { %v1287_v37 = vmul.f32 0.35355338, %v1279_v30 }
 0x3d3   : > { %v1087_v51 = vmul.f32 1.442695, %v1083_v50 }
 0x3d5   : > { %2848 = vpow2.f32 %v1087_v51 }
 0x3d8   : > { %v1076_v52 = vpop.xlane.xlu2 %1075 }
 0x3d9   : > { %v1084_v53 = vsub.f32 %v1068_v35, %v1076_v52  ;;  %v1296_v52 = vsel %vm842_vm2, %v3430_v49, -inf }
 0x3db   : > { %v3386_v54 = vpop.eup %2848  ;;  %v1089_v55 = vmul.f32 1.442695, %v1084_v53 }
 0x3dc   : > { %v1095_v56 = vsel %vm842_vm2, %v3386_v54, 0.0 }
 0x3dd   : > { %2850 = vpow2.f32 %v1089_v55  ;;  %1096 = vadd.xlane.f32.xlu2 %v1095_v56 }
 0x3e0   : > { %v1079_v61 = vpop.xlane.xlu1 %1078 }
 0x3e1   : > { %v1085_v62 = vsub.f32 %v1069_v40, %v1079_v61 }
 0x3e3   : > { %v3390_v57 = vpop.eup %2850  ;;  %v1474_v59 = vpop.permute.xlu0 %1473  ;;  %v1091_v6 = vmul.f32 1.442695, %v1085_v62 }
 0x3e4   : > { %2690 = vmatpush.xpose.msk.msrb.mxu2 %vm1017_vm0, %v1474_v59  ;;  %v1098_v60 = vsel %vm842_vm2, %v3390_v57, 0.0 }
 0x3e5   : > { %1099 = vadd.xlane.f32.xlu0 %v1098_v60 }
 0x3f5   : > { %1471 = vrot.lane.b32.xlu2 %v3296_v1, %s2995_s26  ;;  %s2999_s26 = smov 56  }
 0x3f8   : > { %v1231_v48 = vpop.permute.xlu1 %1230 }
 0x3f9   : > { %1710 = vrot.lane.b32.xlu0 %v3296_v1, %s2996_s25  ;;  %2683 = vmatmul.msk.f32.gmra.mxu3 %vm1017_vm0, %v1231_v48  ;;  %s3000_s25 = smov 40  }
 0x401   : > { %1465 = vrot.lane.b32.xlu0 %v3289_v63, %s2997_s23 }
 0x409   : > { %1706 = vrot.lane.b32.xlu0 %v3292_v58, %s2998_s0 }
 0x40e   : > { %v1082_v0 = vpop.xlane.xlu0 %1081 }
 0x40f   : > { %v1086_v2 = vsub.f32 %v1070_v46, %v1082_v0  ;;  %v3426_v46 = vadd.f32 %v1287_v37, %v3369_v38 }
 0x411   : > { %v1093_v7 = vmul.f32 1.442695, %v1086_v2  ;;  %v1299_v51 = vsel %vm842_vm2, %v3426_v46, -inf }
 0x413   : > { %2852 = vpow2.f32 %v1093_v7 }
 0x414   : > { %2854 = vpow2.f32 %v1091_v6 }
 0x419   : > { %v3402_v8 = vpop.eup %2852 }
 0x41a   : > { %v3404_v9 = vpop.eup %2854  ;;  %v1104_v10 = vsel %vm842_vm2, %v3402_v8, 0.0 }
 0x41b   : > { %1105 = vadd.xlane.f32.xlu1 %v1104_v10  ;;  %v1101_v11 = vsel %vm842_vm2, %v3404_v9, 0.0 }
 0x41e   : > { %1102 = vadd.xlane.f32.xlu2 %v1101_v11 }
 0x421   : > { %v1713_v12 = vpop.permute.xlu0 %1712 }
 0x422   : > { %2702 = vmatpush.xpose.msk.msrb.mxu3 %vm1017_vm0, %v1713_v12 }
 0x433   : > { %1294 = vmax.xlane.f32.xlu0 %v1293_v16 }
 0x434   : > { %1702 = vrot.lane.b32.xlu1 %v3296_v1, %s2998_s0 }
 0x436   : > { %1463 = vrot.lane.b32.xlu2 %v3296_v1, %s2997_s23 }
 0x43c   : > { %1467 = vrot.lane.b32.xlu1 %v3292_v58, %s2997_s23 }
 0x43e   : > { %1704 = vrot.lane.b32.xlu2 %v3289_v63, %s2998_s0 }
 0x444   : > { %1708 = vrot.lane.b32.xlu1 %v3298_v3, %s2998_s0  ;;  %s3994_s0 = scalar_lea.vmem %s3950_s10, %s3120_s20 }
 0x446   : > { %1469 = vrot.lane.b32.xlu2 %v3298_v3, %s2997_s23 }
 0x450   : > { %v1097_v17 = vpop.xlane.xlu2 %1096 }
 0x451   : > { %2856 = vrcp.f32 %v1097_v17  ;;  %v1118_v1 = vand.u32 2147483648, %v1097_v17  ;;  %v1116_v58 = vand.u32 2147483647, %v1097_v17  ;;  %vm1112_vm3 = vweird.f32 %v1097_v17 }
 0x453   : > { %v1119_v26 = vor.u32 1.1754944e-38, %v1118_v1  ;;  %vm1117_vm5 = vcmp.eq.f32.partialorder %v1116_v58, 8.507059e+37 }
 0x457   : > { %v2857_v18 = vpop.eup %2856 }
 0x458   : > { %v1108_v20 = vmul.f32 %v2857_v18, %v1097_v17  ;;  %v1472_v21 = vpop.permute.xlu2 %1471  ;;  %v1100_v22 = vpop.xlane.xlu0 %1099  ;;  %vm1113_vm1 = vweird.f32 %v2857_v18 }
 0x459   : > { %2858 = vrcp.f32 %v1100_v22  ;;  %2691 = vmatpush.xpose.msk.msrb.mxu2 %vm1017_vm0, %v1472_v21  ;;  %vm1114_vm4 = vmor %vm1112_vm3, %vm1113_vm1  ;;  %v1133_v34 = vand.u32 2147483648, %v1100_v22  ;;  %v1131_v36 = vand.u32 2147483647, %v1100_v22  ;;  %vm1127_vm7 = vweird.f32 %v1100_v22 }
 0x45a   : > { %v1109_v23 = vsub.f32 1.0, %v1108_v20 }
 0x45b   : > { %v1134_v41 = vor.u32 1.1754944e-38, %v1133_v34  ;;  %vm1132_vm9 = vcmp.eq.f32.partialorder %v1131_v36, 8.507059e+37 }
 0x45c   : > { %v1110_v24 = vmul.f32 %v2857_v18, %v1109_v23 }
 0x45e   : > { %v1111_v63 = vadd.f32 %v2857_v18, %v1110_v24 }
 0x45f   : > { %v2859_v25 = vpop.eup %2858 }
 0x460   : > { %v1123_v3 = vmul.f32 %v2859_v25, %v1100_v22  ;;  %v1115_v27 = vsel %vm1114_vm4, %v2857_v18, %v1111_v63  ;;  %vm1128_vm6 = vweird.f32 %v2859_v25 }
 0x461   : > { %v1120_v29 = vsel %vm1117_vm5, %v1119_v26, %v1115_v27  ;;  %vm1129_vm8 = vmor %vm1127_vm7, %vm1128_vm6 }
 0x462   : > { %v1124_v31 = vsub.f32 1.0, %v1123_v3  ;;  %v1121_v32 = vmul.f32 %v3386_v54, %v1120_v29 }
 0x464   : > { %v1125_v35 = vmul.f32 %v2859_v25, %v1124_v31  ;;  %2672 = vmatmul.msk.f32.vlgmr.msra.gmra.mxu2 %vm842_vm2, %v1121_v32 }
 0x466   : > { %v1126_v40 = vadd.f32 %v2859_v25, %v1125_v35 }
 0x468   : > { %v1130_v42 = vsel %vm1129_vm8, %v2859_v25, %v1126_v40 }
 0x469   : > { %v1135_v44 = vsel %vm1132_vm9, %v1134_v41, %v1130_v42 }
 0x46a   : > { %v1136_v47 = vmul.f32 %v3390_v57, %v1135_v44 }
 0x46b   : > { %v1711_v50 = vpop.permute.xlu0 %1710 }
 0x46c   : > { %2673 = vmatmul.msk.f32.gmra.mxu2 %vm842_vm2, %v1136_v47  ;;  %2703 = vmatpush.xpose.msk.msrb.mxu3 %vm1017_vm0, %v1711_v50 }
 0x46e   : > { %1300 = vmax.xlane.f32.xlu1 %v1299_v51 }
 0x46f   : > { %1297 = vmax.xlane.f32.xlu2 %v1296_v52 }
 0x473   : > { %v1466_v63 = vpop.permute.xlu0 %1465 }
 0x47b   : > { %v1707_v26 = vpop.permute.xlu0 %1706 }
 0x47c   : > { %v1282_v53 = vpop.f32.mrf.mxu3 }
 0x47d   : > { %v1288_v54 = vmul.f32 0.35355338, %v1282_v53 }
 0x47f   : > { %v3439_v55 = vadd.f32 %v1288_v54, %v3380_v45 }
 0x481   : > { %v1302_v56 = vsel %vm842_vm2, %v3439_v55, -inf }
 0x482   : > { %1303 = vmax.xlane.f32.xlu2 %v1302_v56 }
 0x48e   : > { %v1106_v57 = vpop.xlane.xlu1 %1105 }
 0x48f   : > { %2860 = vrcp.f32 %v1106_v57  ;;  %v1163_v17 = vand.u32 2147483648, %v1106_v57  ;;  %vm1157_vm15 = vweird.f32 %v1106_v57  ;;  %v1161_v20 = vand.u32 2147483647, %v1106_v57 }
 0x491   : > { %v1103_v59 = vpop.xlane.xlu2 %1102  ;;  %v1164_v23 = vor.u32 1.1754944e-38, %v1163_v17  ;;  %vm1162_vm3 = vcmp.eq.f32.partialorder %v1161_v20, 8.507059e+37 }
 0x492   : > { %2862 = vrcp.f32 %v1103_v59  ;;  %v1148_v6 = vand.u32 2147483648, %v1103_v59  ;;  %v1146_v11 = vand.u32 2147483647, %v1103_v59  ;;  %vm1142_vm11 = vweird.f32 %v1103_v59 }
 0x494   : > { %v1149_v13 = vor.u32 1.1754944e-38, %v1148_v6  ;;  %vm1147_vm13 = vcmp.eq.f32.partialorder %v1146_v11, 8.507059e+37 }
 0x495   : > { %v2861_v60 = vpop.eup %2860 }
 0x496   : > { %v1153_v61 = vmul.f32 %v2861_v60, %v1106_v57  ;;  %vm1158_vm14 = vweird.f32 %v2861_v60 }
 0x497   : > { %vm1159_vm1 = vmor %vm1157_vm15, %vm1158_vm14 }
 0x498   : > { %v2863_v48 = vpop.eup %2862  ;;  %v1154_v62 = vsub.f32 1.0, %v1153_v61 }
 0x499   : > { %v1138_v0 = vmul.f32 %v2863_v48, %v1103_v59  ;;  %vm1143_vm10 = vweird.f32 %v2863_v48  ;;  %v1464_v21 = vpop.permute.xlu2 %1463 }
 0x49a   : > { %v1155_v7 = vmul.f32 %v2861_v60, %v1154_v62  ;;  %vm1144_vm12 = vmor %vm1142_vm11, %vm1143_vm10 }
 0x49b   : > { %v1139_v2 = vsub.f32 1.0, %v1138_v0 }
 0x49c   : > { %v1156_v16 = vadd.f32 %v2861_v60, %v1155_v7 }
 0x49d   : > { %v1140_v10 = vmul.f32 %v2863_v48, %v1139_v2 }
 0x49e   : > { %v1160_v22 = vsel %vm1159_vm1, %v2861_v60, %v1156_v16 }
 0x49f   : > { %v1141_v12 = vadd.f32 %v2863_v48, %v1140_v10  ;;  %v1165_v24 = vsel %vm1162_vm3, %v1164_v23, %v1160_v22 }
 0x4a0   : > { %v1166_v58 = vmul.f32 %v3402_v8, %v1165_v24 }
 0x4a1   : > { %v1145_v14 = vsel %vm1144_vm12, %v2863_v48, %v1141_v12  ;;  %v1705_v25 = vpop.permute.xlu2 %1704 }
 0x4a2   : > { %v1150_v18 = vsel %vm1147_vm13, %v1149_v13, %v1145_v14 }
 0x4a3   : > { %v1151_v19 = vmul.f32 %v3404_v9, %v1150_v18 }
 0x4a5   : > { %2674 = vmatmul.msk.f32.gmra.mxu2 %vm842_vm2, %v1151_v19 }
 0x4a6   : > { %v1703_v1 = vpop.permute.xlu1 %1702  ;;  %v1295_v32 = vpop.xlane.xlu0 %1294 }
 0x4a7   : > { %2704 = vmatmul.msk.f32.vlgmr.msrb.gmra.mxu3 %vm1017_vm0, %v1703_v1  ;;  %v1305_v36 = vsub.f32 %v3412_v15, %v1295_v32 }
 0x4a9   : > { %v1470_v8 = vpop.permute.xlu2 %1469  ;;  %v1309_v40 = vmul.f32 1.442695, %v1305_v36 }
 0x4ab   : > { %2864 = vpow2.f32 %v1309_v40 }
 0x4ad   : > { %2675 = vmatmul.msk.f32.gmra.mxu2 %vm842_vm2, %v1166_v58 }
 0x4ae   : > { %v1468_v9 = vpop.permute.xlu1 %1467 }
 0x4af   : > { %2705 = vmatmul.msk.f32.gmra.mxu3 %vm1017_vm0, %v1705_v25 }
 0x4b1   : > { %v3471_v56 = vpop.eup %2864 }
 0x4b5   : > { %2692 = vmatmul.msk.f32.vlgmr.msrb.gmra.mxu2 %vm1017_vm0, %v1464_v21 }
 0x4b6   : > { %v1709_v3 = vpop.permute.xlu1 %1708 }
 0x4b7   : > { %2706 = vmatmul.msk.f32.gmra.mxu3 %vm1017_vm0, %v1707_v26 }
 0x4bd   : > { %2693 = vmatmul.msk.f32.gmra.mxu2 %vm1017_vm0, %v1466_v63 }
 0x4bf   : > { %2707 = vmatmul.msk.f32.gmra.mxu3 %vm1017_vm0, %v1709_v3 }
 0x4c5   : > { %2694 = vmatmul.msk.f32.gmra.mxu2 %vm1017_vm0, %v1468_v9 }
 0x4cd   : > { %2695 = vmatmul.msk.f32.gmra.mxu2 %vm1017_vm0, %v1470_v8 }
 0x4e1   : > { %v1301_v48 = vpop.xlane.xlu1 %1300 }
 0x4e2   : > { %v1298_v42 = vpop.xlane.xlu2 %1297  ;;  %v1307_v6 = vsub.f32 %v3426_v46, %v1301_v48 }
 0x4e3   : > { %v1306_v50 = vsub.f32 %v3430_v49, %v1298_v42  ;;  %v1317_v49 = vsel %vm842_vm2, %v3471_v56, 0.0 }
 0x4e4   : > { %v1313_v16 = vmul.f32 1.442695, %v1307_v6 }
 0x4e5   : > { %v1311_v52 = vmul.f32 1.442695, %v1306_v50 }
 0x4e7   : > { %v1208_v27 = vpop.f32.mrf.mxu2  ;;  %2866 = vpow2.f32 %v1311_v52 }
 0x4e8   : > { %1220 = vst.msk [vmem:[#allocation3] sm:$0xff] %vm1017_vm0, %v1208_v27  ;;  %2868 = vpow2.f32 %v1313_v16 }
 0x4ed   : > { %v3480_v0 = vpop.eup %2866 }
 0x4ee   : > { %v1320_v12 = vsel %vm842_vm2, %v3480_v0, 0.0 }
 0x4ef   : > { %v1211_v29 = vpop.f32.mrf.mxu2 }
 0x4f0   : > { %1221 = vst.msk [vmem:[#allocation3 + $0x8] sm:$0xff] %vm1017_vm0, %v1211_v29 }
 0x4f5   : > { %v1304_v17 = vpop.xlane.xlu2 %1303 }
 0x4f6   : > { %v1308_v21 = vsub.f32 %v3439_v55, %v1304_v17 }
 0x4f8   : > { %v1315_v58 = vmul.f32 1.442695, %v1308_v21 }
 0x4fa   : > { %2870 = vpow2.f32 %v1315_v58 }
 0x528   : > { %v1214_v30 = vpop.f32.mrf.mxu2 }
 0x529   : > { %1222 = vst.msk [vmem:[#allocation3 + $0x10] sm:$0xff] %vm1017_vm0, %v1214_v30 }
 0x52a   : > { %v1751_v31 = vpop.f32.mrf.mxu3 }
 0x52b   : > { %v1763_v34 = vmul.f32 0.35355338, %v1751_v31 }
 0x52d   : > { %v3459_v35 = vadd.f32 %v1763_v34, %v3355_v28 }
 0x52f   : > { %v1771_v37 = vsel %vm842_vm2, %v3459_v35, -inf }
 0x530   : > { %1772 = vmax.xlane.f32.xlu1 %v1771_v37  ;;  %v1217_v39 = vpop.f32.mrf.mxu2 }
 0x531   : > { %1223 = vst.msk [vmem:[#allocation3 + $0x18] sm:$0xff] %vm1017_vm0, %v1217_v39 }
 0x532   : > { %v1754_v41 = vpop.f32.mrf.mxu3 }
 0x533   : > { %v1764_v44 = vmul.f32 0.35355338, %v1754_v41 }
 0x535   : > { %v3466_v47 = vadd.f32 %v1764_v44, %v3362_v33 }
 0x537   : > { %v1774_v15 = vsel %vm842_vm2, %v3466_v47, -inf }
 0x538   : > { %1775 = vmax.xlane.f32.xlu0 %v1774_v15  ;;  %v1512_v51 = vpop.f32.mrf.mxu2 }
 0x539   : > { %v1524_v7 = vmul.f32 0.35355338, %v1512_v51 }
 0x53a   : > { %v1757_v53 = vpop.f32.mrf.mxu3 }
 0x53b   : > { %v1765_v54 = vmul.f32 0.35355338, %v1757_v53  ;;  %v1528_v19 = vadd.f32 %v1524_v7, %v3355_v28  ;;  %v3500_v28 = vpop.eup %2868 }
 0x53c   : > { %v1323_v55 = vsel %vm842_vm2, %v3500_v28, 0.0  ;;  %v3506_v63 = vpop.eup %2870 }
 0x53d   : > { %v3474_v57 = vadd.f32 %v1765_v54, %v3369_v38  ;;  %v1532_v22 = vsel %vm842_vm2, %v1528_v19, -inf  ;;  %v1326_v25 = vsel %vm842_vm2, %v3506_v63, 0.0 }
 0x53f   : > { %v1777_v59 = vsel %vm842_vm2, %v3474_v57, -inf }
 0x540   : > { %1778 = vmax.xlane.f32.xlu2 %v1777_v59  ;;  %1318 = vadd.xlane.f32.xlu0 %v1317_v49  ;;  %v1515_v60 = vpop.f32.mrf.mxu2 }
 0x541   : > { %v1525_v10 = vmul.f32 0.35355338, %v1515_v60 }
 0x542   : > { %v1760_v61 = vpop.f32.mrf.mxu3 }
 0x543   : > { %v1766_v62 = vmul.f32 0.35355338, %v1760_v61  ;;  %v1529_v46 = vadd.f32 %v1525_v10, %v3362_v33 }
 0x545   : > { %v3483_v2 = vadd.f32 %v1766_v62, %v3380_v45  ;;  %v1535_v23 = vsel %vm842_vm2, %v1529_v46, -inf }
 0x547   : > { %v1780_v11 = vsel %vm842_vm2, %v3483_v2, -inf }
 0x548   : > { %1781 = vmax.xlane.f32.xlu2 %v1780_v11  ;;  %1321 = vadd.xlane.f32.xlu0 %v1320_v12  ;;  %v1518_v13 = vpop.f32.mrf.mxu2 }
 0x549   : > { %v1526_v14 = vmul.f32 0.35355338, %v1518_v13 }
 0x54b   : > { %v1530_v18 = vadd.f32 %v1526_v14, %v3369_v38 }
 0x54d   : > { %v1538_v20 = vsel %vm842_vm2, %v1530_v18, -inf }
 0x54e   : > { %1539 = vmax.xlane.f32.xlu1 %v1538_v20 }
 0x550   : > { %1533 = vmax.xlane.f32.xlu0 %v1532_v22  ;;  %1536 = vmax.xlane.f32.xlu2 %v1535_v23  ;;  %v1521_v1 = vpop.f32.mrf.mxu2 }
 0x551   : > { %v1527_v24 = vmul.f32 0.35355338, %v1521_v1 }
 0x553   : > { %v3498_v38 = vadd.f32 %v1527_v24, %v3380_v45 }
 0x555   : > { %v1541_v33 = vsel %vm842_vm2, %v3498_v38, -inf }
 0x556   : > { %1542 = vmax.xlane.f32.xlu1 %v1541_v33 }
 0x558   : > { %1324 = vadd.xlane.f32.xlu2 %v1323_v55 }
 0x560   : > { %1327 = vadd.xlane.f32.xlu2 %v1326_v25 }
 0x564   : > { %2806 = vrot.lane.b32.xlu0 %v3302_v4, %s2999_s26 }
 0x56f   : > { %2801 = vrot.lane.b32.xlu1 %v3322_v5, %s2999_s26 }
 0x5a3   : > { %v1773_v45 = vpop.xlane.xlu1 %1772 }
 0x5a4   : > { %v1783_v9 = vsub.f32 %v3459_v35, %v1773_v45 }
 0x5a6   : > { %v1787_v26 = vmul.f32 1.442695, %v1783_v9 }
 0x5a8   : > { %2872 = vpow2.f32 %v1787_v26 }
 0x5ab   : > { %v1776_v3 = vpop.xlane.xlu0 %1775 }
 0x5ac   : > { %v1784_v42 = vsub.f32 %v3466_v47, %v1776_v3 }
 0x5ae   : > { %v3513_v8 = vpop.eup %2872  ;;  %v1789_v51 = vmul.f32 1.442695, %v1784_v42 }
 0x5af   : > { %v1795_v27 = vsel %vm842_vm2, %v3513_v8, 0.0 }
 0x5b0   : > { %1796 = vadd.xlane.f32.xlu0 %v1795_v27 }
 0x5b3   : > { %v1779_v29 = vpop.xlane.xlu2 %1778  ;;  %v3517_v30 = vpop.xlane.xlu0 %1318 }
 0x5b4   : > { %v1785_v15 = vsub.f32 %v3474_v57, %v1779_v29  ;;  %v1340_v22 = vand.u32 2147483648, %v3517_v30  ;;  %vm1334_vm4 = vweird.f32 %v3517_v30  ;;  %v1338_v1 = vand.u32 2147483647, %v3517_v30 }
 0x5b6   : > { %v1791_v52 = vmul.f32 1.442695, %v1785_v15  ;;  %v1341_v26 = vor.u32 1.1754944e-38, %v1340_v22  ;;  %vm1339_vm6 = vcmp.eq.f32.partialorder %v1338_v1, 8.507059e+37 }
 0x5bb   : > { %v1782_v31 = vpop.xlane.xlu2 %1781  ;;  %v3519_v32 = vpop.xlane.xlu0 %1321 }
 0x5bc   : > { %v1786_v57 = vsub.f32 %v3483_v2, %v1782_v31  ;;  %vm1349_vm8 = vweird.f32 %v3519_v32 }
 0x5be   : > { %v1793_v62 = vmul.f32 1.442695, %v1786_v57 }
 0x5c1   : > { %v1540_v34 = vpop.xlane.xlu1 %1539 }
 0x5c2   : > { %v1546_v36 = vsub.f32 %v1530_v18, %v1540_v34 }
 0x5c3   : > { %v1534_v37 = vpop.xlane.xlu0 %1533  ;;  %v1537_v39 = vpop.xlane.xlu2 %1536 }
 0x5c4   : > { %v1552_v35 = vmul.f32 1.442695, %v1546_v36  ;;  %v1544_v40 = vsub.f32 %v1528_v19, %v1534_v37  ;;  %v1545_v41 = vsub.f32 %v1529_v46, %v1537_v39  ;;  %v1355_v36 = vand.u32 2147483648, %v3519_v32 }
 0x5c6   : > { %2874 = vpow2.f32 %v1552_v35  ;;  %v1548_v44 = vmul.f32 1.442695, %v1544_v40  ;;  %v1550_v50 = vmul.f32 1.442695, %v1545_v41  ;;  %v1353_v35 = vand.u32 2147483647, %v3519_v32 }
 0x5c8   : > { %2876 = vpow2.f32 %v1548_v44  ;;  %v1356_v44 = vor.u32 1.1754944e-38, %v1355_v36  ;;  %vm1354_vm10 = vcmp.eq.f32.partialorder %v1353_v35, 8.507059e+37 }
 0x5c9   : > { %2878 = vpow2.f32 %v1550_v50  ;;  %v3549_v14 = vpop.xlane.xlu1 %1542 }
 0x5ca   : > { %2880 = vrcp.f32 %v3517_v30 }
 0x5cb   : > { %2882 = vpow2.f32 %v1789_v51  ;;  %v3543_v10 = vpop.xlane.xlu2 %1324 }
 0x5cc   : > { %v3524_v53 = vpop.eup %2874  ;;  %2884 = vpow2.f32 %v1791_v52  ;;  %v1370_v52 = vand.u32 2147483648, %v3543_v10  ;;  %vm1364_vm12 = vweird.f32 %v3543_v10 }
 0x5cd   : > { %v1562_v54 = vsel %vm842_vm2, %v3524_v53, 0.0  ;;  %2886 = vrcp.f32 %v3519_v32 }
 0x5ce   : > { %v3528_v59 = vpop.eup %2876  ;;  %1563 = vadd.xlane.f32.xlu0 %v1562_v54  ;;  %2888 = vpow2.f32 %v1793_v62 }
 0x5cf   : > { %v3530_v47 = vpop.eup %2878  ;;  %v1556_v49 = vsel %vm842_vm2, %v3528_v59, 0.0  ;;  %2890 = vrcp.f32 %v3543_v10 }
 0x5d0   : > { %v2881_v60 = vpop.eup %2880  ;;  %1557 = vadd.xlane.f32.xlu2 %v1556_v49  ;;  %v1559_v61 = vsel %vm842_vm2, %v3530_v47, 0.0  ;;  %v1371_v49 = vor.u32 1.1754944e-38, %v1370_v52 }
 0x5d1   : > { %1560 = vadd.xlane.f32.xlu1 %v1559_v61  ;;  %v1330_v48 = vmul.f32 %v2881_v60, %v3517_v30  ;;  %v3539_v6 = vpop.eup %2882  ;;  %vm1335_vm0 = vweird.f32 %v2881_v60 }
 0x5d2   : > { %v3541_v7 = vpop.eup %2884  ;;  %v1798_v11 = vsel %vm842_vm2, %v3539_v6, 0.0  ;;  %vm3562_vm5 = vmor %vm1334_vm4, %vm1335_vm0 }
 0x5d3   : > { %v1331_v2 = vsub.f32 1.0, %v1330_v48  ;;  %v2887_v12 = vpop.eup %2886  ;;  %v1801_v13 = vsel %vm842_vm2, %v3541_v7, 0.0  ;;  %v3555_v20 = vpop.xlane.xlu2 %1327 }
 0x5d4   : > { %v1345_v17 = vmul.f32 %v2887_v12, %v3519_v32  ;;  %v3553_v18 = vpop.eup %2888  ;;  %2892 = vrcp.f32 %v3555_v20  ;;  %vm1350_vm7 = vweird.f32 %v2887_v12  ;;  %v1368_v32 = vand.u32 2147483647, %v3543_v10 }
 0x5d5   : > { %v1332_v16 = vmul.f32 %v2881_v60, %v1331_v2  ;;  %v2891_v21 = vpop.eup %2890  ;;  %v1804_v23 = vsel %vm842_vm2, %v3553_v18, 0.0  ;;  %vm1351_vm9 = vmor %vm1349_vm8, %vm1350_vm7  ;;  %v1385_v48 = vand.u32 2147483648, %v3555_v20  ;;  %vm1379_vm1 = vweird.f32 %v3555_v20 }
 0x5d6   : > { %v1346_v46 = vsub.f32 1.0, %v1345_v17  ;;  %v1360_v25 = vmul.f32 %v2891_v21, %v3543_v10  ;;  %v2807_v45 = vpop.permute.xlu0 %2806  ;;  %vm1365_vm11 = vweird.f32 %v2891_v21  ;;  %vm1369_vm14 = vcmp.eq.f32.partialorder %v1368_v32, 8.507059e+37 }
 0x5d7   : > { %v1333_v19 = vadd.f32 %v2881_v60, %v1332_v16  ;;  %v2808_v27 = vunpack.i.l.bf16 %v2807_v45  ;;  %v2809_v37 = vunpack.i.h.bf16 %v2807_v45  ;;  %vm1366_vm13 = vmor %vm1364_vm12, %vm1365_vm11  ;;  %v1383_v62 = vand.u32 2147483647, %v3555_v20 }
 0x5d8   : > { %1799 = vadd.xlane.f32.xlu2 %v1798_v11  ;;  %v1347_v55 = vmul.f32 %v2887_v12, %v1346_v46  ;;  %v1361_v30 = vsub.f32 1.0, %v1360_v25  ;;  %v1386_v2 = vor.u32 1.1754944e-38, %v1385_v48 }
 0x5d9   : > { %1802 = vadd.xlane.f32.xlu1 %v1801_v13  ;;  %v1337_v9 = vsel %vm3562_vm5, %v2881_v60, %v1333_v19  ;;  %vm1384_vm0 = vcmp.eq.f32.partialorder %v1383_v62, 8.507059e+37 }
 0x5da   : > { %v1342_v29 = vsel %vm1339_vm6, %v1341_v26, %v1337_v9  ;;  %v1348_v31 = vadd.f32 %v2887_v12, %v1347_v55  ;;  %v2893_v34 = vpop.eup %2892  ;;  %v1362_v40 = vmul.f32 %v2891_v21, %v1361_v30 }
 0x5db   : > { %v1343_v39 = vmul.f32 %v3471_v56, %v1342_v29  ;;  %v1375_v41 = vmul.f32 %v2893_v34, %v3555_v20  ;;  %vm1380_vm15 = vweird.f32 %v2893_v34 }
 0x5dc   : > { %v1352_v42 = vsel %vm1351_vm9, %v2887_v12, %v1348_v31  ;;  %v1363_v51 = vadd.f32 %v2891_v21, %v1362_v40  ;;  %vm1381_vm3 = vmor %vm1379_vm1, %vm1380_vm15 }
 0x5dd   : > { %v1357_v50 = vsel %vm1354_vm10, %v1356_v44, %v1352_v42  ;;  %v1376_v15 = vsub.f32 1.0, %v1375_v41 }
 0x5de   : > { %v1358_v56 = vmul.f32 %v3480_v0, %v1357_v50  ;;  %v1367_v57 = vsel %vm1366_vm13, %v2891_v21, %v1363_v51 }
 0x5df   : > { %v1377_v54 = vmul.f32 %v2893_v34, %v1376_v15  ;;  %v1372_v60 = vsel %vm1369_vm14, %v1371_v49, %v1367_v57 }
 0x5e0   : > { %v1373_v0 = vmul.f32 %v3500_v28, %v1372_v60 }
 0x5e1   : > { %1805 = vadd.xlane.f32.xlu1 %v1804_v23  ;;  %v2802_v24 = vpop.permute.xlu1 %2801  ;;  %v1378_v61 = vadd.f32 %v2893_v34, %v1377_v54 }
 0x5e2   : > { %2826 = vrot.lane.b32.xlu0 %v3302_v4, %s3000_s25  ;;  %v2803_v33 = vunpack.i.l.bf16 %v2802_v24  ;;  %v2804_v3 = vunpack.i.h.bf16 %v2802_v24 }
 0x5e3   : > { %v1382_v10 = vsel %vm1381_vm3, %v2893_v34, %v1378_v61 }
 0x5e4   : > { %1425 = vmatpush.msrb.mxu0 %v2803_v33  ;;  %v1387_v11 = vsel %vm1384_vm0, %v1386_v2, %v1382_v10 }
 0x5e5   : > { %v1388_v12 = vmul.f32 %v3506_v63, %v1387_v11 }
 0x5e6   : > { %1426 = vmatpush.msrb.mxu0 %v2804_v3 }
 0x5e8   : > { %1427 = vmatpush.msrb.mxu0 %v2808_v27 }
 0x5ea   : > { %1428 = vmatpush.msrb.mxu0 %v2809_v37 }
 0x5eb   : > { %2684 = vmatmul.msk.f32.vlgmr.msrb.gmra.mxu0 %vm842_vm2, %v1343_v39 }
 0x5f0   : > { %2811 = vrot.lane.b32.xlu2 %v3322_v5, %s3001_s1 }
 0x5f3   : > { %2685 = vmatmul.msk.f32.gmra.mxu0 %vm842_vm2, %v1358_v56 }
 0x5f8   : > { %2816 = vrot.lane.b32.xlu2 %v3322_v5, %s3000_s25  ;;  %v1547_v5 = vsub.f32 %v3498_v38, %v3549_v14 }
 0x5fa   : > { %v1554_v13 = vmul.f32 1.442695, %v1547_v5 }
 0x5fb   : > { %2686 = vmatmul.msk.f32.gmra.mxu0 %vm842_vm2, %v1373_v0 }
 0x5fc   : > { %2894 = vpow2.f32 %v1554_v13 }
 0x600   : > { %2821 = vrot.lane.b32.xlu2 %v3302_v4, %s3001_s1 }
 0x602   : > { %v3596_v28 = vpop.eup %2894 }
 0x603   : > { %2687 = vmatmul.msk.f32.gmra.mxu0 %vm842_vm2, %v1388_v12  ;;  %v1565_v16 = vsel %vm842_vm2, %v3596_v28, 0.0 }
 0x623   : > { %v1797_v17 = vpop.xlane.xlu0 %1796 }
 0x624   : > { %2896 = vrcp.f32 %v1797_v17  ;;  %vm1812_vm5 = vweird.f32 %v1797_v17  ;;  %v1818_v34 = vand.u32 2147483648, %v1797_v17  ;;  %v1816_v37 = vand.u32 2147483647, %v1797_v17 }
 0x626   : > { %v1819_v52 = vor.u32 1.1754944e-38, %v1818_v34  ;;  %vm1817_vm8 = vcmp.eq.f32.partialorder %v1816_v37, 8.507059e+37 }
 0x629   : > { %1566 = vadd.xlane.f32.xlu2 %v1565_v16 }
 0x62a   : > { %v2897_v63 = vpop.eup %2896 }
 0x62b   : > { %v1808_v38 = vmul.f32 %v2897_v63, %v1797_v17  ;;  %vm1813_vm4 = vweird.f32 %v2897_v63 }
 0x62c   : > { %vm3632_vm6 = vmor %vm1812_vm5, %vm1813_vm4 }
 0x62d   : > { %v1809_v21 = vsub.f32 1.0, %v1808_v38 }
 0x62f   : > { %v1810_v24 = vmul.f32 %v2897_v63, %v1809_v21 }
 0x631   : > { %v1811_v26 = vadd.f32 %v2897_v63, %v1810_v24 }
 0x633   : > { %v1815_v35 = vsel %vm3632_vm6, %v2897_v63, %v1811_v26 }
 0x634   : > { %v1820_v57 = vsel %vm1817_vm8, %v1819_v52, %v1815_v35 }
 0x635   : > { %v1821_v16 = vmul.f32 %v3513_v8, %v1820_v57 }
 0x641   : > { %v3617_v58 = vpop.xlane.xlu0 %1563 }
 0x643   : > { %v3600_v19 = vpop.xlane.xlu2 %1557 }
 0x644   : > { %v3602_v4 = vpop.xlane.xlu1 %1560  ;;  %2898 = vrcp.f32 %v3600_v19  ;;  %v1579_v56 = vand.u32 2147483648, %v3600_v19  ;;  %vm1573_vm9 = vweird.f32 %v3600_v19  ;;  %v1577_v54 = vand.u32 2147483647, %v3600_v19 }
 0x645   : > { %vm1588_vm1 = vweird.f32 %v3602_v4 }
 0x646   : > { %v1580_v11 = vor.u32 1.1754944e-38, %v1579_v56  ;;  %vm1578_vm12 = vcmp.eq.f32.partialorder %v1577_v54, 8.507059e+37 }
 0x64a   : > { %v3608_v14 = vpop.eup %2898 }
 0x64b   : > { %v3605_v46 = vpop.xlane.xlu2 %1799  ;;  %v1569_v22 = vmul.f32 %v3608_v14, %v3600_v19  ;;  %vm1574_vm7 = vweird.f32 %v3608_v14 }
 0x64c   : > { %2900 = vrcp.f32 %v3605_v46  ;;  %v3611_v20 = vpop.xlane.xlu1 %1802  ;;  %vm3651_vm10 = vmor %vm1573_vm9, %vm1574_vm7  ;;  %v1833_v12 = vand.u32 2147483648, %v3605_v46  ;;  %vm1827_vm13 = vweird.f32 %v3605_v46  ;;  %v1831_v17 = vand.u32 2147483647, %v3605_v46 }
 0x64d   : > { %2902 = vrcp.f32 %v3602_v4  ;;  %v1570_v25 = vsub.f32 1.0, %v1569_v22  ;;  %vm1842_vm5 = vweird.f32 %v3611_v20  ;;  %v1846_v36 = vand.u32 2147483647, %v3611_v20 }
 0x64e   : > { %2904 = vrcp.f32 %v3611_v20  ;;  %v1834_v24 = vor.u32 1.1754944e-38, %v1833_v12  ;;  %vm1832_vm3 = vcmp.eq.f32.partialorder %v1831_v17, 8.507059e+37  ;;  %vm1603_vm9 = vweird.f32 %v3617_v58 }
 0x64f   : > { %2906 = vrcp.f32 %v3617_v58  ;;  %v1571_v27 = vmul.f32 %v3608_v14, %v1570_v25 }
 0x651   : > { %v1572_v44 = vadd.f32 %v3608_v14, %v1571_v27 }
 0x652   : > { %v3615_v23 = vpop.eup %2900 }
 0x653   : > { %v2812_v1 = vpop.permute.xlu2 %2811  ;;  %v3620_v55 = vpop.eup %2902  ;;  %v1823_v45 = vmul.f32 %v3615_v23, %v3605_v46  ;;  %v1576_v62 = vsel %vm3651_vm10, %v3608_v14, %v1572_v44  ;;  %vm1828_vm11 = vweird.f32 %v3615_v23  ;;  %vm1847_vm10 = vcmp.eq.f32.partialorder %v1846_v36, 8.507059e+37 }
 0x654   : > { %v2813_v33 = vunpack.i.l.bf16 %v2812_v1  ;;  %v2814_v9 = vunpack.i.h.bf16 %v2812_v1  ;;  %v1584_v3 = vmul.f32 %v3620_v55, %v3602_v4  ;;  %v3628_v30 = vpop.xlane.xlu1 %1805  ;;  %v3630_v31 = vpop.eup %2904  ;;  %v1581_v38 = vsel %vm1578_vm12, %v1580_v11, %v1576_v62  ;;  %vm3669_vm14 = vmor %vm1827_vm13, %vm1828_vm11 }
 0x655   : > { %v1824_v29 = vsub.f32 1.0, %v1823_v45  ;;  %2908 = vrcp.f32 %v3628_v30  ;;  %v3639_v42 = vpop.eup %2906  ;;  %v1838_v15 = vmul.f32 %v3630_v31, %v3611_v20  ;;  %v2827_v51 = vpop.permute.xlu0 %2826  ;;  %vm1589_vm15 = vweird.f32 %v3620_v55 }
 0x656   : > { %1664 = vmatpush.msrb.mxu1 %v2813_v33  ;;  %v1585_v40 = vsub.f32 1.0, %v1584_v3  ;;  %v1599_v49 = vmul.f32 %v3639_v42, %v3617_v58  ;;  %v2828_v48 = vunpack.i.l.bf16 %v2827_v51  ;;  %v2829_v5 = vunpack.i.h.bf16 %v2827_v51  ;;  %vm1590_vm0 = vmor %vm1588_vm1, %vm1589_vm15 }
 0x657   : > { %v1825_v50 = vmul.f32 %v3615_v23, %v1824_v29  ;;  %v1839_v0 = vsub.f32 1.0, %v1838_v15  ;;  %v1594_v1 = vand.u32 2147483648, %v3602_v4  ;;  %v1582_v25 = vmul.f32 %v3528_v59, %v1581_v38 }
 0x658   : > { %1665 = vmatpush.msrb.mxu1 %v2814_v9  ;;  %v1586_v61 = vmul.f32 %v3620_v55, %v1585_v40  ;;  %v1600_v19 = vsub.f32 1.0, %v1599_v49  ;;  %v1592_v45 = vand.u32 2147483647, %v3602_v4  ;;  %vm1843_vm4 = vweird.f32 %v3630_v31 }
 0x659   : > { %v1826_v10 = vadd.f32 %v3615_v23, %v1825_v50  ;;  %v1840_v21 = vmul.f32 %v3630_v31, %v1839_v0  ;;  %v1595_v4 = vor.u32 1.1754944e-38, %v1594_v1  ;;  %v1848_v29 = vand.u32 2147483648, %v3611_v20  ;;  %vm1844_vm7 = vmor %vm1842_vm5, %vm1843_vm4  ;;  %v1947_v1 = vld [vmem:[%s3993_s21 + $0x10] sm:$0xff] }
 0x65a   : > { %v1587_v46 = vadd.f32 %v3620_v55, %v1586_v61  ;;  %v1601_v9 = vmul.f32 %v3639_v42, %v1600_v19  ;;  %vm1593_vm6 = vcmp.eq.f32.partialorder %v1592_v45, 8.507059e+37  ;;  %vm1604_vm8 = vweird.f32 %v3639_v42 }
 0x65b   : > { %v2817_v39 = vpop.permute.xlu2 %2816  ;;  %v3661_v2 = vpop.eup %2908  ;;  %v1830_v8 = vsel %vm3669_vm14, %v3615_v23, %v1826_v10  ;;  %v1841_v59 = vadd.f32 %v3630_v31, %v1840_v21  ;;  %v1609_v40 = vand.u32 2147483648, %v3617_v58  ;;  %v1607_v20 = vand.u32 2147483647, %v3617_v58  ;;  %vm1605_vm11 = vmor %vm1603_vm9, %vm1604_vm8 }
 0x65c   : > { %v2818_v41 = vunpack.i.l.bf16 %v2817_v39  ;;  %v2819_v32 = vunpack.i.h.bf16 %v2817_v39  ;;  %v1853_v22 = vmul.f32 %v3661_v2, %v3628_v30  ;;  %v1835_v3 = vsel %vm1832_vm3, %v1834_v24, %v1830_v8  ;;  %v1946_v24 = vld [vmem:[%s3993_s21 + $0x8] sm:$0xff] }
 0x65d   : > { %v1591_v27 = vsel %vm1590_vm0, %v3620_v55, %v1587_v46  ;;  %v1836_v34 = vmul.f32 %v3539_v6, %v1835_v3  ;;  %v1845_v55 = vsel %vm1844_vm7, %v3630_v31, %v1841_v59  ;;  %v1602_v35 = vadd.f32 %v3639_v42, %v1601_v9  ;;  %v1948_v46 = vld [vmem:[%s3993_s21 + $0x18] sm:$0xff] }
 0x65e   : > { %1903 = vmatpush.msra.mxu0 %v2818_v41  ;;  %v1854_v23 = vsub.f32 1.0, %v1853_v22  ;;  %v1596_v37 = vsel %vm1593_vm6, %v1595_v4, %v1591_v27  ;;  %v1849_v41 = vor.u32 1.1754944e-38, %v1848_v29  ;;  %vm1858_vm12 = vweird.f32 %v3661_v2  ;;  %1977 = vmatpush.msra.mxu2 %v1948_v46 }
 0x65f   : > { %v1597_v6 = vmul.f32 %v3530_v47, %v1596_v37  ;;  %v1606_v31 = vsel %vm1605_vm11, %v3639_v42, %v1602_v35  ;;  %v1610_v51 = vor.u32 1.1754944e-38, %v1609_v40  ;;  %v1863_v52 = vand.u32 2147483648, %v3628_v30  ;;  %v2936_v40 = vld [vmem:[#allocation2] sm:$0xff] }
 0x660   : > { %1904 = vmatpush.msra.mxu0 %v2819_v32  ;;  %v1855_v39 = vmul.f32 %v3661_v2, %v1854_v23  ;;  %v1850_v50 = vsel %vm1847_vm10, %v1849_v41, %v1845_v55  ;;  %vm1857_vm13 = vweird.f32 %v3628_v30  ;;  %vm1608_vm14 = vcmp.eq.f32.partialorder %v1607_v20, 8.507059e+37  ;;  %1978 = vmatpush.msra.mxu2 %v1947_v1 }
 0x661   : > { %v1851_v47 = vmul.f32 %v3541_v7, %v1850_v50  ;;  %v1861_v58 = vand.u32 2147483647, %v3628_v30  ;;  %v1611_v56 = vsel %vm1608_vm14, %v1610_v51, %v1606_v31  ;;  %vm1859_vm15 = vmor %vm1857_vm13, %vm1858_vm12  ;;  %v1864_v32 = vor.u32 1.1754944e-38, %v1863_v52  ;;  %v2937_v50 = vld [vmem:[#allocation2 + $0x8] sm:$0xff] }
 0x662   : > { %1905 = vmatpush.msra.mxu0 %v2828_v48  ;;  %v1856_v15 = vadd.f32 %v3661_v2, %v1855_v39  ;;  %v1612_v54 = vmul.f32 %v3524_v53, %v1611_v56  ;;  %vm1458_vm6 = vcmask 130112   ;;  %1979 = vmatpush.msra.mxu2 %v1946_v24  ;;  %vm1697_vm7 = vcmask 195712   ;;  %v2833_v39 = vld [vmem:[%s3994_s0] ss:$0 sm:$0xff]  ;;  %s3997_s0 = sld [smem:[#allocation16_spill]] (!%p2724_p5) }
 0x663   : > { %v2822_v13 = vpop.permute.xlu2 %2821  ;;  %vm1862_vm1 = vcmp.eq.f32.partialorder %v1861_v58, 8.507059e+37  ;;  %vm1936_vm8 = vcmask 261312  }
 0x664   : > { %1906 = vmatpush.msra.mxu0 %v2829_v5  ;;  %v2823_v63 = vunpack.i.l.bf16 %v2822_v13  ;;  %v2824_v33 = vunpack.i.h.bf16 %v2822_v13  ;;  %v1860_v42 = vsel %vm1859_vm15, %v3661_v2, %v1856_v15 }
 0x665   : > { %2708 = vmatmul.msk.f32.vlgmr.msra.gmra.mxu0 %vm842_vm2, %v1821_v16  ;;  %v1865_v49 = vsel %vm1862_vm1, %v1864_v32, %v1860_v42 }
 0x666   : > { %1666 = vmatpush.msrb.mxu1 %v2823_v63  ;;  %v1866_v7 = vmul.f32 %v3553_v18, %v1865_v49 }
 0x668   : > { %v1430_v26 = vpop.f32.mrf.mxu0  ;;  %1667 = vmatpush.msrb.mxu1 %v2824_v33  ;;  %v1945_v33 = vld [vmem:[%s3993_s21] sm:$0xff] }
 0x669   : > { %2696 = vmatmul.msk.f32.vlgmr.msrb.gmra.mxu1 %vm842_vm2, %v1582_v25  ;;  %1446 = vrot.lane.b32.xlu1 %v1430_v26, %s3002_s19 }
 0x66a   : > { %1980 = vmatpush.msra.mxu2 %v1945_v33 }
 0x66d   : > { %2709 = vmatmul.msk.f32.gmra.mxu0 %vm842_vm2, %v1836_v34 }
 0x670   : > { %v1433_v44 = vpop.f32.mrf.mxu0 }
 0x671   : > { %2697 = vmatmul.msk.f32.gmra.mxu1 %vm842_vm2, %v1597_v6  ;;  %1448 = vrot.lane.b32.xlu1 %v1433_v44, %s3002_s19 }
 0x675   : > { %2710 = vmatmul.msk.f32.gmra.mxu0 %vm842_vm2, %v1851_v47  ;;  %v2938_v47 = vld [vmem:[#allocation2 + $0x10] sm:$0xff] }
 0x678   : > { %v1436_v57 = vpop.f32.mrf.mxu0 }
 0x679   : > { %2698 = vmatmul.msk.f32.gmra.mxu1 %vm842_vm2, %v1612_v54  ;;  %1450 = vrot.lane.b32.xlu1 %v1436_v57, %s3002_s19  ;;  %v2939_v54 = vld [vmem:[#allocation2 + $0x18] sm:$0xff] }
 0x67d   : > { %2711 = vmatmul.msk.f32.gmra.mxu0 %vm842_vm2, %v1866_v7 }
 0x680   : > { %v1439_v5 = vpop.f32.mrf.mxu0 }
 0x69c   : > { %v1567_v30 = vpop.xlane.xlu2 %1566 }
 0x69d   : > { %2910 = vrcp.f32 %v1567_v30  ;;  %v1624_v0 = vand.u32 2147483648, %v1567_v30  ;;  %v1622_v53 = vand.u32 2147483647, %v1567_v30  ;;  %vm1618_vm0 = vweird.f32 %v1567_v30 }
 0x69f   : > { %v1625_v2 = vor.u32 1.1754944e-38, %v1624_v0  ;;  %vm1623_vm5 = vcmp.eq.f32.partialorder %v1622_v53, 8.507059e+37 }
 0x6a3   : > { %v2911_v60 = vpop.eup %2910 }
 0x6a4   : > { %v1614_v61 = vmul.f32 %v2911_v60, %v1567_v30  ;;  %vm1619_vm3 = vweird.f32 %v2911_v60 }
 0x6a5   : > { %vm1620_vm4 = vmor %vm1618_vm0, %vm1619_vm3 }
 0x6a6   : > { %v1615_v48 = vsub.f32 1.0, %v1614_v61 }
 0x6a8   : > { %v1616_v62 = vmul.f32 %v2911_v60, %v1615_v48 }
 0x6aa   : > { %v1617_v10 = vadd.f32 %v2911_v60, %v1616_v62 }
 0x6ac   : > { %v1621_v11 = vsel %vm1620_vm4, %v2911_v60, %v1617_v10 }
 0x6ad   : > { %v1626_v12 = vsel %vm1623_vm5, %v1625_v2, %v1621_v11 }
 0x6ae   : > { %v1627_v18 = vmul.f32 %v3596_v28, %v1626_v12 }
 0x6b0   : > { %2699 = vmatmul.msk.f32.gmra.mxu1 %vm842_vm2, %v1627_v18 }
 0x6db   : > { %v1447_v13 = vpop.permute.xlu1 %1446 }
 0x6dc   : > { %1459 = vst.msk [vmem:[#allocation3] sm:$0xff] %vm1458_vm6, %v1447_v13 }
 0x6e2   : > { %v1908_v16 = vpop.f32.mrf.mxu0 }
 0x6e3   : > { %v1449_v17 = vpop.permute.xlu1 %1448  ;;  %1924 = vrot.lane.b32.xlu0 %v1908_v16, %s3003_s18 }
 0x6e4   : > { %1460 = vst.msk [vmem:[#allocation3 + $0x8] sm:$0xff] %vm1458_vm6, %v1449_v17 }
 0x6e6   : > { %v1669_v19 = vpop.f32.mrf.mxu1 }
 0x6ea   : > { %v1911_v63 = vpop.f32.mrf.mxu0 }
 0x6eb   : > { %v1451_v38 = vpop.permute.xlu1 %1450  ;;  %1685 = vrot.lane.b32.xlu0 %v1669_v19, %s3004_s22  ;;  %1926 = vrot.lane.b32.xlu2 %v1911_v63, %s3003_s18 }
 0x6ec   : > { %1461 = vst.msk [vmem:[#allocation3 + $0x10] sm:$0xff] %vm1458_vm6, %v1451_v38 }
 0x6ee   : > { %v1672_v28 = vpop.f32.mrf.mxu1 }
 0x6f2   : > { %v1914_v14 = vpop.f32.mrf.mxu0 }
 0x6f3   : > { %1687 = vrot.lane.b32.xlu0 %v1672_v28, %s3004_s22  ;;  %1928 = vrot.lane.b32.xlu1 %v1914_v14, %s3003_s18  ;;  %v2105_v28 = vld [vmem:[%s3160_s7 + $0x18] sm:$0xff]  ;;  %v2104_v14 = vld [vmem:[%s3160_s7 + $0x10] sm:$0xff] }
 0x6f4   : > { %2134 = vmatpush.msra.mxu1 %v2105_v28  ;;  %v3821_v28 = vld [vmem:[%s752_s9] ss:$0 sm:$0xff] }
 0x6f6   : > { %v1675_v21 = vpop.f32.mrf.mxu1  ;;  %2135 = vmatpush.msra.mxu1 %v2104_v14 }
 0x6fa   : > { %v1917_v22 = vpop.f32.mrf.mxu0 }
 0x6fb   : > { %1689 = vrot.lane.b32.xlu0 %v1675_v21, %s3004_s22  ;;  %v2103_v21 = vld [vmem:[%s3160_s7 + $0x8] sm:$0xff] }
 0x6fc   : > { %2136 = vmatpush.msra.mxu1 %v2103_v21 }
 0x703   : > { %1452 = vrot.lane.b32.xlu0 %v1439_v5, %s3002_s19 }
 0x70b   : > { %1930 = vrot.lane.b32.xlu0 %v1917_v22, %s3003_s18  ;;  %v2102_v22 = vld [vmem:[%s3160_s7] sm:$0xff]  ;;  %s3995_s18 = scalar_lea.vmem %s3956_s16, %s3120_s20 }
 0x70c   : > { %2137 = vmatpush.msra.mxu1 %v2102_v22 }
 0x72d   : > { %v1678_v8 = vpop.f32.mrf.mxu1 }
 0x72e   : > { %1691 = vrot.lane.b32.xlu1 %v1678_v8, %s3004_s22  ;;  %s3996_s22 = sld [smem:[#allocation15_spill]] (!%p2724_p5) }
 0x745   : > { %v1927_v26 = vpop.permute.xlu2 %1926 }
 0x755   : > { %v1925_v25 = vpop.permute.xlu0 %1924 }
 0x75d   : > { %v1686_v45 = vpop.permute.xlu0 %1685 }
 0x75e   : > { %1698 = vst.msk [vmem:[#allocation3] sm:$0xff] %vm1697_vm7, %v1686_v45 }
 0x75f   : > { %1937 = vst.msk [vmem:[#allocation3] sm:$0xff] %vm1936_vm8, %v1925_v25 }
 0x765   : > { %v1688_v9 = vpop.permute.xlu0 %1687  ;;  %v1929_v27 = vpop.permute.xlu1 %1928 }
 0x766   : > { %1699 = vst.msk [vmem:[#allocation3 + $0x8] sm:$0xff] %vm1697_vm7, %v1688_v9  ;;  %v1941_v3 = vld [vmem:[#allocation3] sm:$0xff] }
 0x767   : > { %1938 = vst.msk [vmem:[#allocation3 + $0x8] sm:$0xff] %vm1936_vm8, %v1927_v26  ;;  %2712 = vmatmul.msk.f32.vlgmr.msra.gmra.mxu2 %vm842_vm2, %v1941_v3 }
 0x76d   : > { %v1690_v23 = vpop.permute.xlu0 %1689 }
 0x76e   : > { %1700 = vst.msk [vmem:[#allocation3 + $0x10] sm:$0xff] %vm1697_vm7, %v1690_v23  ;;  %v1942_v59 = vld [vmem:[#allocation3 + $0x8] sm:$0xff] }
 0x76f   : > { %1939 = vst.msk [vmem:[#allocation3 + $0x10] sm:$0xff] %vm1936_vm8, %v1929_v27  ;;  %2713 = vmatmul.msk.f32.gmra.mxu2 %vm842_vm2, %v1942_v59 }
 0x775   : > { %v1453_v4 = vpop.permute.xlu0 %1452 }
 0x776   : > { %1462 = vst.msk [vmem:[#allocation3 + $0x18] sm:$0xff] %vm1458_vm6, %v1453_v4  ;;  %v1943_v29 = vld [vmem:[#allocation3 + $0x10] sm:$0xff] }
 0x777   : > { %2714 = vmatmul.msk.f32.gmra.mxu2 %vm842_vm2, %v1943_v29 }
 0x77d   : > { %v1931_v36 = vpop.permute.xlu0 %1930 }
 0x7a0   : > { %v1692_v34 = vpop.permute.xlu1 %1691 }
 0x7a1   : > { %1701 = vst.msk [vmem:[#allocation3 + $0x18] sm:$0xff] %vm1697_vm7, %v1692_v34 }
 0x7a2   : > { %1940 = vst.msk [vmem:[#allocation3 + $0x18] sm:$0xff] %vm1936_vm8, %v1931_v36 }
 0x7a9   : > { %v1944_v37 = vld [vmem:[#allocation3 + $0x18] sm:$0xff] }
 0x7aa   : > { %2715 = vmatmul.msk.f32.gmra.mxu2 %vm842_vm2, %v1944_v37  ;;  %v2834_v37 = vld [vmem:[%s741_s17] ss:$0 sm:$0xff] }
 0x7ea   : > { %v1982_v55 = vpop.f32.mrf.mxu2 }
 0x7eb   : > { %v1983_v35 = vadd.f32 %v2833_v39, %v1982_v55 }
 0x7ed   : > { %v3751_v41 = vadd.f32 %v2936_v40, %v1983_v35  ;;  %v2835_v40 = vld [vmem:[%s744_s27] ss:$0 sm:$0xff] }
 0x7ef   : > { %v2000_v6 = vsel %vm842_vm2, %v3751_v41, 0.0 }
 0x7f0   : > { %2001 = vadd.xlane.f32.xlu2 %v2000_v6 }
 0x7f2   : > { %v1985_v20 = vpop.f32.mrf.mxu2 }
 0x7f3   : > { %v1986_v44 = vadd.f32 %v2833_v39, %v1985_v20 }
 0x7f5   : > { %v3755_v31 = vadd.f32 %v2937_v50, %v1986_v44 }
 0x7f7   : > { %v2003_v15 = vsel %vm842_vm2, %v3755_v31, 0.0 }
 0x7f8   : > { %2004 = vadd.xlane.f32.xlu1 %v2003_v15 }
 0x7fa   : > { %v1988_v51 = vpop.f32.mrf.mxu2 }
 0x7fb   : > { %v1989_v52 = vadd.f32 %v2833_v39, %v1988_v51 }
 0x7fd   : > { %v3759_v58 = vadd.f32 %v2938_v47, %v1989_v52 }
 0x7ff   : > { %v2006_v56 = vsel %vm842_vm2, %v3759_v58, 0.0 }
 0x800   : > { %2007 = vadd.xlane.f32.xlu0 %v2006_v56 }
 0x82d   : > { %v1991_v42 = vpop.f32.mrf.mxu2 }
 0x82e   : > { %v1992_v32 = vadd.f32 %v2833_v39, %v1991_v42 }
 0x830   : > { %v3763_v57 = vadd.f32 %v2939_v54, %v1992_v32 }
 0x832   : > { %v2009_v49 = vsel %vm842_vm2, %v3763_v57, 0.0 }
 0x833   : > { %2010 = vadd.xlane.f32.xlu2 %v2009_v49 }
 0x863   : > { %v2002_v7 = vpop.xlane.xlu2 %2001 }
 0x864   : > { %v2012_v30 = vmul.f32 %v2002_v7, %v3232_v43 }
 0x866   : > { %v2016_v60 = vsub.f32 %v3751_v41, %v2012_v30 }
 0x868   : > { %v2020_v61 = vmul.f32 %v2016_v60, %v2016_v60 }
 0x86a   : > { %v2024_v48 = vsel %vm842_vm2, %v2020_v61, 0.0 }
 0x86b   : > { %2025 = vadd.xlane.f32.xlu1 %v2024_v48  ;;  %v2005_v0 = vpop.xlane.xlu1 %2004 }
 0x86c   : > { %v2013_v62 = vmul.f32 %v2005_v0, %v3232_v43 }
 0x86e   : > { %v3772_v53 = vsub.f32 %v3755_v31, %v2013_v62 }
 0x870   : > { %v2021_v10 = vmul.f32 %v3772_v53, %v3772_v53 }
 0x872   : > { %v2027_v2 = vsel %vm842_vm2, %v2021_v10, 0.0 }
 0x873   : > { %2028 = vadd.xlane.f32.xlu0 %v2027_v2  ;;  %v2008_v11 = vpop.xlane.xlu0 %2007 }
 0x874   : > { %v2014_v12 = vmul.f32 %v2008_v11, %v3232_v43 }
 0x876   : > { %v3779_v18 = vsub.f32 %v3759_v58, %v2014_v12 }
 0x878   : > { %v2022_v5 = vmul.f32 %v3779_v18, %v3779_v18 }
 0x87a   : > { %v2030_v13 = vsel %vm842_vm2, %v2022_v5, 0.0 }
 0x87b   : > { %2031 = vadd.xlane.f32.xlu2 %v2030_v13 }
 0x8a6   : > { %v2011_v16 = vpop.xlane.xlu2 %2010 }
 0x8a7   : > { %v2015_v17 = vmul.f32 %v2011_v16, %v3232_v43 }
 0x8a9   : > { %v3786_v19 = vsub.f32 %v3763_v57, %v2015_v17 }
 0x8ab   : > { %v2023_v63 = vmul.f32 %v3786_v19, %v3786_v19 }
 0x8ad   : > { %v2033_v38 = vsel %vm842_vm2, %v2023_v63, 0.0 }
 0x8ae   : > { %2034 = vadd.xlane.f32.xlu1 %v2033_v38 }
 0x8de   : > { %v2026_v8 = vpop.xlane.xlu1 %2025 }
 0x8df   : > { %v2036_v46 = vmul.f32 %v2026_v8, %v3232_v43 }
 0x8e1   : > { %v2040_v1 = vadd.f32 1e-06, %v2036_v46 }
 0x8e3   : > { %2912 = vrsqrt.f32 %v2040_v1  ;;  %vm2050_vm10 = vweird.f32 %v2040_v1 }
 0x8e6   : > { %v2029_v24 = vpop.xlane.xlu0 %2028 }
 0x8e7   : > { %v2037_v33 = vmul.f32 %v2029_v24, %v3232_v43 }
 0x8e9   : > { %v2913_v25 = vpop.eup %2912  ;;  %v2041_v45 = vadd.f32 1e-06, %v2037_v33 }
 0x8ea   : > { %v2045_v9 = vmul.f32 %v2913_v25, %v2040_v1  ;;  %vm2051_vm9 = vweird.f32 %v2913_v25 }
 0x8eb   : > { %2914 = vrsqrt.f32 %v2041_v45  ;;  %vm2052_vm11 = vmor %vm2050_vm10, %vm2051_vm9  ;;  %vm2060_vm13 = vweird.f32 %v2041_v45 }
 0x8ec   : > { %v2046_v26 = vmul.f32 %v2913_v25, %v2045_v9  ;;  %v2317_v9 = vld [vmem:[%s3170_s2 + $0x30] sm:$0xff] }
 0x8ee   : > { %v2047_v3 = vmul.f32 0.5, %v2046_v26  ;;  %v2032_v23 = vpop.xlane.xlu2 %2031 }
 0x8ef   : > { %v2038_v27 = vmul.f32 %v2032_v23, %v3232_v43  ;;  %v2316_v23 = vld [vmem:[%s3170_s2 + $0x28] sm:$0xff] }
 0x8f0   : > { %v2048_v59 = vsub.f32 1.5, %v2047_v3 }
 0x8f1   : > { %v2915_v4 = vpop.eup %2914  ;;  %v2042_v29 = vadd.f32 1e-06, %v2038_v27 }
 0x8f2   : > { %v2049_v34 = vmul.f32 %v2913_v25, %v2048_v59  ;;  %v2055_v36 = vmul.f32 %v2915_v4, %v2041_v45  ;;  %vm2061_vm12 = vweird.f32 %v2915_v4 }
 0x8f3   : > { %2916 = vrsqrt.f32 %v2042_v29  ;;  %vm2062_vm14 = vmor %vm2060_vm13, %vm2061_vm12  ;;  %vm2070_vm1 = vweird.f32 %v2042_v29 }
 0x8f4   : > { %v2053_v39 = vsel %vm2052_vm11, %v2913_v25, %v2049_v34  ;;  %v2056_v55 = vmul.f32 %v2915_v4, %v2055_v36  ;;  %v2318_v25 = vld [vmem:[%s3170_s2 + $0x38] sm:$0xff]  ;;  %v2315_v34 = vld [vmem:[%s3170_s2 + $0x20] sm:$0xff] }
 0x8f5   : > { %v2084_v35 = vmul.f32 %v2053_v39, %v2016_v60  ;;  %2344 = vmatpush.msra.mxu3 %v2318_v25  ;;  %v2314_v39 = vld [vmem:[%s3170_s2 + $0x18] sm:$0xff] }
 0x8f6   : > { %v2057_v6 = vmul.f32 0.5, %v2056_v55 }
 0x8f7   : > { %v2091_v20 = vmul.f32 %v2834_v37, %v2084_v35  ;;  %2345 = vmatpush.msra.mxu3 %v2317_v9 }
 0x8f8   : > { %v2058_v44 = vsub.f32 1.5, %v2057_v6 }
 0x8f9   : > { %v2917_v50 = vpop.eup %2916  ;;  %v2098_v15 = vadd.f32 %v2835_v40, %v2091_v20  ;;  %2346 = vmatpush.msra.mxu3 %v2316_v23  ;;  %v2313_v20 = vld [vmem:[%s3170_s2 + $0x10] sm:$0xff] }
 0x8fa   : > { %v2059_v51 = vmul.f32 %v2915_v4, %v2058_v44  ;;  %v2065_v52 = vmul.f32 %v2917_v50, %v2042_v29  ;;  %vm2071_vm15 = vweird.f32 %v2917_v50  ;;  %v2312_v44 = vld [vmem:[%s3170_s2 + $0x8] sm:$0xff] }
 0x8fb   : > { %2716 = vmatmul.msk.f32.vlgmr.msra.gmra.mxu1 %vm842_vm2, %v2098_v15  ;;  %vm2072_vm3 = vmor %vm2070_vm1, %vm2071_vm15  ;;  %2347 = vmatpush.msra.mxu3 %v2315_v34 }
 0x8fc   : > { %v2063_v47 = vsel %vm2062_vm14, %v2915_v4, %v2059_v51  ;;  %v2066_v56 = vmul.f32 %v2917_v50, %v2065_v52  ;;  %v2311_v51 = vld [vmem:[%s3170_s2] sm:$0xff] }
 0x8fd   : > { %v2085_v42 = vmul.f32 %v2063_v47, %v3772_v53  ;;  %2348 = vmatpush.msra.mxu3 %v2314_v39 }
 0x8fe   : > { %v2067_v32 = vmul.f32 0.5, %v2066_v56 }
 0x8ff   : > { %v2092_v54 = vmul.f32 %v2834_v37, %v2085_v42  ;;  %2349 = vmatpush.msra.mxu3 %v2313_v20 }
 0x900   : > { %v2068_v49 = vsub.f32 1.5, %v2067_v32 }
 0x901   : > { %v2099_v7 = vadd.f32 %v2835_v40, %v2092_v54  ;;  %2350 = vmatpush.msra.mxu3 %v2312_v44 }
 0x902   : > { %v2069_v30 = vmul.f32 %v2917_v50, %v2068_v49 }
 0x903   : > { %2717 = vmatmul.msk.f32.gmra.mxu1 %vm842_vm2, %v2099_v7  ;;  %2351 = vmatpush.msra.mxu3 %v2311_v51 }
 0x904   : > { %v2073_v60 = vsel %vm2072_vm3, %v2917_v50, %v2069_v30 }
 0x905   : > { %v2086_v61 = vmul.f32 %v2073_v60, %v3779_v18 }
 0x907   : > { %v2093_v48 = vmul.f32 %v2834_v37, %v2086_v61 }
 0x909   : > { %v2100_v0 = vadd.f32 %v2835_v40, %v2093_v48 }
 0x90b   : > { %2718 = vmatmul.msk.f32.gmra.mxu1 %vm842_vm2, %v2100_v0 }
 0x921   : > { %v2035_v62 = vpop.xlane.xlu1 %2034 }
 0x922   : > { %v2039_v53 = vmul.f32 %v2035_v62, %v3232_v43 }
 0x924   : > { %v2043_v10 = vadd.f32 1e-06, %v2039_v53 }
 0x926   : > { %2918 = vrsqrt.f32 %v2043_v10  ;;  %vm2080_vm4 = vweird.f32 %v2043_v10 }
 0x92c   : > { %v2919_v2 = vpop.eup %2918 }
 0x92d   : > { %v2075_v11 = vmul.f32 %v2919_v2, %v2043_v10  ;;  %vm2081_vm0 = vweird.f32 %v2919_v2 }
 0x92e   : > { %vm2082_vm5 = vmor %vm2080_vm4, %vm2081_vm0  ;;  %vm2323_vm4 = vcmask 523264  }
 0x92f   : > { %v2076_v12 = vmul.f32 %v2919_v2, %v2075_v11 }
 0x931   : > { %v2077_v5 = vmul.f32 0.5, %v2076_v12 }
 0x933   : > { %v2078_v13 = vsub.f32 1.5, %v2077_v5 }
 0x935   : > { %v2079_v16 = vmul.f32 %v2919_v2, %v2078_v13 }
 0x937   : > { %v2083_v18 = vsel %vm2082_vm5, %v2919_v2, %v2079_v16 }
 0x938   : > { %v2087_v17 = vmul.f32 %v2083_v18, %v3786_v19 }
 0x93a   : > { %v2094_v63 = vmul.f32 %v2834_v37, %v2087_v17 }
 0x93c   : > { %v2101_v38 = vadd.f32 %v2835_v40, %v2094_v63 }
 0x93e   : > { %2719 = vmatmul.msk.f32.gmra.mxu1 %vm842_vm2, %v2101_v38 }
 0x978   : > { %v2139_v14 = vpop.f32.mrf.mxu1 }
 0x979   : > { %v3824_v21 = vadd.f32 %v3821_v28, %v2139_v14 }
 0x97b   : > { %v3827_v22 = vmul.f32 0.70710677, %v3824_v21 }
 0x97d   : > { %v2167_v19 = vand.u32 2147483647, %v3827_v22  ;;  %vm2159_vm0 = vcmp.ge.f32.partialorder %v3827_v22, 0.0 }
 0x97f   : > { %v2171_v8 = vmul.f32 0.3275911, %v2167_v19  ;;  %v2275_v54 = vsub.f32 0.0, %v2167_v19 }
 0x980   : > { %v2142_v46 = vpop.f32.mrf.mxu1 }
 0x981   : > { %v2175_v1 = vadd.f32 1.0, %v2171_v8  ;;  %v3831_v24 = vadd.f32 %v3821_v28, %v2142_v46  ;;  %v2279_v48 = vmul.f32 %v2275_v54, %v2167_v19 }
 0x983   : > { %2920 = vrcp.f32 %v2175_v1  ;;  %v3834_v33 = vmul.f32 0.70710677, %v3831_v24  ;;  %v2190_v55 = vand.u32 2147483648, %v2175_v1  ;;  %v2188_v6 = vand.u32 2147483647, %v2175_v1 }
 0x984   : > { %vm2184_vm7 = vweird.f32 %v2175_v1  ;;  %v2283_v13 = vmul.f32 1.442695, %v2279_v48 }
 0x985   : > { %v3838_v45 = vand.u32 2147483647, %v3834_v33  ;;  %v2191_v52 = vor.u32 1.1754944e-38, %v2190_v55  ;;  %vm2189_vm9 = vcmp.eq.f32.partialorder %v2188_v6, 8.507059e+37  ;;  %vm2160_vm5 = vcmp.ge.f32.partialorder %v3834_v33, 0.0 }
 0x987   : > { %v2172_v26 = vmul.f32 0.3275911, %v3838_v45  ;;  %v2276_v17 = vsub.f32 0.0, %v3838_v45 }
 0x988   : > { %v2145_v3 = vpop.f32.mrf.mxu1 }
 0x989   : > { %v2921_v27 = vpop.eup %2920  ;;  %v3844_v59 = vadd.f32 %v3821_v28, %v2145_v3  ;;  %v2176_v29 = vadd.f32 1.0, %v2172_v26  ;;  %v2280_v26 = vmul.f32 %v2276_v17, %v3838_v45 }
 0x98a   : > { %v2180_v4 = vmul.f32 %v2921_v27, %v2175_v1  ;;  %vm2185_vm6 = vweird.f32 %v2921_v27 }
 0x98b   : > { %v3848_v36 = vmul.f32 0.70710677, %v3844_v59  ;;  %2922 = vrcp.f32 %v2176_v29  ;;  %vm2186_vm8 = vmor %vm2184_vm7, %vm2185_vm6  ;;  %v2205_v61 = vand.u32 2147483648, %v2176_v29  ;;  %v2203_v62 = vand.u32 2147483647, %v2176_v29 }
 0x98c   : > { %v2181_v37 = vsub.f32 1.0, %v2180_v4  ;;  %vm2199_vm11 = vweird.f32 %v2176_v29 }
 0x98d   : > { %v3852_v35 = vand.u32 2147483647, %v3848_v36  ;;  %v2206_v5 = vor.u32 1.1754944e-38, %v2205_v61  ;;  %vm2204_vm13 = vcmp.eq.f32.partialorder %v2203_v62, 8.507059e+37  ;;  %vm2161_vm6 = vcmp.ge.f32.partialorder %v3848_v36, 0.0 }
 0x98e   : > { %v2182_v40 = vmul.f32 %v2921_v27, %v2181_v37 }
 0x98f   : > { %v2173_v50 = vmul.f32 0.3275911, %v3852_v35  ;;  %v2277_v34 = vsub.f32 0.0, %v3852_v35 }
 0x990   : > { %v2183_v15 = vadd.f32 %v2921_v27, %v2182_v40  ;;  %v2285_v40 = vmul.f32 1.442695, %v2280_v26 }
 0x991   : > { %v2177_v47 = vadd.f32 1.0, %v2173_v50  ;;  %v2923_v56 = vpop.eup %2922 }
 0x992   : > { %v2187_v42 = vsel %vm2186_vm8, %v2921_v27, %v2183_v15  ;;  %v2195_v49 = vmul.f32 %v2923_v56, %v2176_v29  ;;  %vm2200_vm10 = vweird.f32 %v2923_v56  ;;  %v2281_v15 = vmul.f32 %v2277_v34, %v3852_v35 }
 0x993   : > { %v2192_v32 = vsel %vm2189_vm9, %v2191_v52, %v2187_v42  ;;  %2924 = vrcp.f32 %v2177_v47  ;;  %vm2201_vm12 = vmor %vm2199_vm11, %vm2200_vm10  ;;  %v2220_v14 = vand.u32 2147483648, %v2177_v47  ;;  %v2218_v1 = vand.u32 2147483647, %v2177_v47 }
 0x994   : > { %v2239_v7 = vmul.f32 1.0614054, %v2192_v32  ;;  %v2196_v30 = vsub.f32 1.0, %v2195_v49  ;;  %2926 = vpow2.f32 %v2283_v13  ;;  %vm2214_vm15 = vweird.f32 %v2177_v47 }
 0x995   : > { %v2221_v27 = vor.u32 1.1754944e-38, %v2220_v14  ;;  %vm2219_vm3 = vcmp.eq.f32.partialorder %v2218_v1, 8.507059e+37  ;;  %2928 = vpow2.f32 %v2285_v40 }
 0x996   : > { %v2243_v60 = vadd.f32 -1.4531521, %v2239_v7  ;;  %v2197_v0 = vmul.f32 %v2923_v56, %v2196_v30  ;;  %v2287_v7 = vmul.f32 1.442695, %v2281_v15 }
 0x998   : > { %v2247_v53 = vmul.f32 %v2243_v60, %v2192_v32  ;;  %v2198_v2 = vadd.f32 %v2923_v56, %v2197_v0  ;;  %v2151_v60 = vmul.f32 0.5, %v3824_v21  ;;  %2930 = vpow2.f32 %v2287_v7 }
 0x999   : > { %v2925_v10 = vpop.eup %2924 }
 0x99a   : > { %v2251_v11 = vadd.f32 1.4214138, %v2247_v53  ;;  %v2210_v12 = vmul.f32 %v2925_v10, %v2177_v47  ;;  %v2202_v16 = vsel %vm2201_vm12, %v2923_v56, %v2198_v2  ;;  %vm2215_vm14 = vweird.f32 %v2925_v10  ;;  %v2927_v20 = vpop.eup %2926 }
 0x99b   : > { %v2207_v38 = vsel %vm2204_vm13, %v2206_v5, %v2202_v16  ;;  %vm2216_vm1 = vmor %vm2214_vm15, %vm2215_vm14  ;;  %v3005_v56 = vmov -1.0   ;;  %v2929_v0 = vpop.eup %2928  ;;  %v2152_v16 = vmul.f32 0.5, %v3831_v24 }
 0x99c   : > { %v2255_v18 = vmul.f32 %v2251_v11, %v2192_v32  ;;  %v2211_v63 = vsub.f32 1.0, %v2210_v12  ;;  %v2240_v19 = vmul.f32 1.0614054, %v2207_v38  ;;  %v2163_v42 = vsel %vm2159_vm0, 1.0, %v3005_v56 }
 0x99d   : > { %v2164_v11 = vsel %vm2160_vm5, 1.0, %v3005_v56 }
 0x99e   : > { %v2259_v8 = vadd.f32 -0.28449672, %v2255_v18  ;;  %v2212_v46 = vmul.f32 %v2925_v10, %v2211_v63  ;;  %v2244_v25 = vadd.f32 -1.4531521, %v2240_v19  ;;  %v2931_v13 = vpop.eup %2930 }
 0x9a0   : > { %v2263_v9 = vmul.f32 %v2259_v8, %v2192_v32  ;;  %v2213_v3 = vadd.f32 %v2925_v10, %v2212_v46  ;;  %v2248_v23 = vmul.f32 %v2244_v25, %v2207_v38  ;;  %v2153_v8 = vmul.f32 0.5, %v3844_v59 }
 0x9a2   : > { %v2267_v4 = vadd.f32 0.2548296, %v2263_v9  ;;  %v2217_v29 = vsel %vm2216_vm1, %v2925_v10, %v2213_v3  ;;  %v2252_v37 = vadd.f32 1.4214138, %v2248_v23 }
 0x9a3   : > { %v2222_v39 = vsel %vm2219_vm3, %v2221_v27, %v2217_v29 }
 0x9a4   : > { %v2271_v55 = vmul.f32 %v2267_v4, %v2192_v32  ;;  %v2241_v6 = vmul.f32 1.0614054, %v2222_v39  ;;  %v2256_v44 = vmul.f32 %v2252_v37, %v2207_v38 }
 0x9a6   : > { %v2291_v45 = vmul.f32 %v2927_v20, %v2271_v55  ;;  %v2245_v50 = vadd.f32 -1.4531521, %v2241_v6  ;;  %v2260_v51 = vadd.f32 -0.28449672, %v2256_v44 }
 0x9a8   : > { %v2295_v52 = vsub.f32 1.0, %v2291_v45  ;;  %v2249_v47 = vmul.f32 %v2245_v50, %v2222_v39  ;;  %v2264_v54 = vmul.f32 %v2260_v51, %v2207_v38 }
 0x9aa   : > { %v2299_v49 = vmul.f32 %v2295_v52, %v2163_v42  ;;  %v2253_v32 = vadd.f32 1.4214138, %v2249_v47  ;;  %v2268_v30 = vadd.f32 0.2548296, %v2264_v54 }
 0x9ac   : > { %v2303_v61 = vadd.f32 1.0, %v2299_v49  ;;  %v2257_v22 = vmul.f32 %v2253_v32, %v2222_v39  ;;  %v2272_v48 = vmul.f32 %v2268_v30, %v2207_v38  ;;  %v2165_v38 = vsel %vm2161_vm6, 1.0, %v3005_v56 }
 0x9ae   : > { %v2307_v35 = vmul.f32 %v2303_v61, %v2151_v60  ;;  %v2261_v62 = vadd.f32 -0.28449672, %v2257_v22  ;;  %v2292_v53 = vmul.f32 %v2929_v0, %v2272_v48  ;;  %v2837_v48 = vld [vmem:[%s3995_s18] ss:$0 sm:$0xff] }
 0x9b0   : > { %2720 = vmatmul.msk.f32.vlgmr.msra.gmra.mxu3 %vm2323_vm4, %v2307_v35  ;;  %v2265_v10 = vmul.f32 %v2261_v62, %v2222_v39  ;;  %v2296_v2 = vsub.f32 1.0, %v2292_v53 }
 0x9b2   : > { %v2269_v12 = vadd.f32 0.2548296, %v2265_v10  ;;  %v2300_v5 = vmul.f32 %v2296_v2, %v2164_v11 }
 0x9b4   : > { %v2273_v21 = vmul.f32 %v2269_v12, %v2222_v39  ;;  %v2304_v18 = vadd.f32 1.0, %v2300_v5 }
 0x9b6   : > { %v2293_v17 = vmul.f32 %v2931_v13, %v2273_v21  ;;  %v2308_v63 = vmul.f32 %v2304_v18, %v2152_v16 }
 0x9b8   : > { %v2297_v33 = vsub.f32 1.0, %v2293_v17  ;;  %2721 = vmatmul.msk.f32.gmra.mxu3 %vm2323_vm4, %v2308_v63 }
 0x9ba   : > { %v2301_v14 = vmul.f32 %v2297_v33, %v2165_v38 }
 0x9bb   : > { %v2148_v19 = vpop.f32.mrf.mxu1 }
 0x9bc   : > { %v2149_v46 = vadd.f32 %v3821_v28, %v2148_v19  ;;  %v2305_v1 = vadd.f32 1.0, %v2301_v14 }
 0x9be   : > { %v2158_v25 = vmul.f32 0.70710677, %v2149_v46  ;;  %v2309_v9 = vmul.f32 %v2305_v1, %v2153_v8  ;;  %v2154_v60 = vmul.f32 0.5, %v2149_v46 }
 0x9c0   : > { %v2170_v24 = vand.u32 2147483647, %v2158_v25  ;;  %2722 = vmatmul.msk.f32.gmra.mxu3 %vm2323_vm4, %v2309_v9  ;;  %vm2162_vm11 = vcmp.ge.f32.partialorder %v2158_v25, 0.0 }
 0x9c1   : > { %v2166_v7 = vsel %vm2162_vm11, 1.0, %v3005_v56 }
 0x9c2   : > { %v2174_v36 = vmul.f32 0.3275911, %v2170_v24  ;;  %v2278_v39 = vsub.f32 0.0, %v2170_v24 }
 0x9c4   : > { %v2178_v26 = vadd.f32 1.0, %v2174_v36  ;;  %v2282_v20 = vmul.f32 %v2278_v39, %v2170_v24 }
 0x9c6   : > { %2932 = vrcp.f32 %v2178_v26  ;;  %v2235_v4 = vand.u32 2147483648, %v2178_v26  ;;  %v2233_v34 = vand.u32 2147483647, %v2178_v26  ;;  %vm2229_vm8 = vweird.f32 %v2178_v26 }
 0x9c7   : > { %v2289_v50 = vmul.f32 1.442695, %v2282_v20 }
 0x9c8   : > { %v2236_v28 = vor.u32 1.1754944e-38, %v2235_v4  ;;  %vm2234_vm10 = vcmp.eq.f32.partialorder %v2233_v34, 8.507059e+37 }
 0x9c9   : > { %2934 = vpow2.f32 %v2289_v50 }
 0x9cc   : > { %v2933_v3 = vpop.eup %2932 }
 0x9cd   : > { %v2225_v23 = vmul.f32 %v2933_v3, %v2178_v26  ;;  %vm2230_vm7 = vweird.f32 %v2933_v3 }
 0x9ce   : > { %vm2231_vm9 = vmor %vm2229_vm8, %vm2230_vm7 }
 0x9cf   : > { %v2226_v27 = vsub.f32 1.0, %v2225_v23  ;;  %v2935_v54 = vpop.eup %2934 }
 0x9d1   : > { %v2227_v29 = vmul.f32 %v2933_v3, %v2226_v27 }
 0x9d3   : > { %v2228_v59 = vadd.f32 %v2933_v3, %v2227_v29 }
 0x9d5   : > { %v2232_v37 = vsel %vm2231_vm9, %v2933_v3, %v2228_v59 }
 0x9d6   : > { %v2237_v55 = vsel %vm2234_vm10, %v2236_v28, %v2232_v37 }
 0x9d7   : > { %v2242_v40 = vmul.f32 1.0614054, %v2237_v55 }
 0x9d9   : > { %v2246_v6 = vadd.f32 -1.4531521, %v2242_v40 }
 0x9db   : > { %v2250_v44 = vmul.f32 %v2246_v6, %v2237_v55 }
 0x9dd   : > { %v2254_v45 = vadd.f32 1.4214138, %v2250_v44 }
 0x9df   : > { %v2258_v15 = vmul.f32 %v2254_v45, %v2237_v55 }
 0x9e1   : > { %v2262_v51 = vadd.f32 -0.28449672, %v2258_v15 }
 0x9e3   : > { %v2266_v52 = vmul.f32 %v2262_v51, %v2237_v55 }
 0x9e5   : > { %v2270_v47 = vadd.f32 0.2548296, %v2266_v52 }
 0x9e7   : > { %v2274_v42 = vmul.f32 %v2270_v47, %v2237_v55 }
 0x9e9   : > { %v2294_v49 = vmul.f32 %v2935_v54, %v2274_v42 }
 0x9eb   : > { %v2298_v32 = vsub.f32 1.0, %v2294_v49 }
 0x9ed   : > { %v2302_v30 = vmul.f32 %v2298_v32, %v2166_v7 }
 0x9ef   : > { %v2306_v61 = vadd.f32 1.0, %v2302_v30 }
 0x9f1   : > { %v2310_v22 = vmul.f32 %v2306_v61, %v2154_v60 }
 0x9f3   : > { %2723 = vmatmul.msk.f32.gmra.mxu3 %vm2323_vm4, %v2310_v22 }
 0xa33   : > { %v2353_v0 = vpop.f32.mrf.mxu3 }
 0xa34   : > { %v2354_v35 = vadd.f32 %v2837_v48, %v2353_v0 }
 0xa36   : > { %v2365_v62 = vadd.f32 %v2354_v35, %v3751_v41 }
 0xa38   : > { %2369 = vst.msk [vmem:[#allocation2] sm:$0xff] %vm842_vm2, %v2365_v62 }
 0xa3b   : > { %v2356_v53 = vpop.f32.mrf.mxu3 }
 0xa3c   : > { %v2357_v10 = vadd.f32 %v2837_v48, %v2356_v53 }
 0xa3e   : > { %v2366_v56 = vadd.f32 %v2357_v10, %v3755_v31 }
 0xa40   : > { %2370 = vst.msk [vmem:[#allocation2 + $0x8] sm:$0xff] %vm842_vm2, %v2366_v56 }
 0xa43   : > { %v2359_v2 = vpop.f32.mrf.mxu3 }
 0xa44   : > { %v2360_v11 = vadd.f32 %v2837_v48, %v2359_v2 }
 0xa46   : > { %v2367_v12 = vadd.f32 %v2360_v11, %v3759_v58 }
 0xa48   : > { %2371 = vst.msk [vmem:[#allocation2 + $0x10] sm:$0xff] %vm842_vm2, %v2367_v12 }
 0xa76   : > { %v2362_v5 = vpop.f32.mrf.mxu3 }
 0xa77   : > { %v2363_v21 = vadd.f32 %v2837_v48, %v2362_v5  ;;  %2376 = sbr.rel (%p2724_p5) target bundleno = 2962 (0xb92), region = 104 }
 0xa79   : > { %v2368_v13 = vadd.f32 %v2363_v21, %v3763_v57 }
 0xa7b   : > { %2372 = vst.msk [vmem:[#allocation2 + $0x18] sm:$0xff] %vm842_vm2, %v2368_v13 }
 0xa7c   : > { %v2385_v41 = vsel %vm842_vm2, %v2367_v12, 0.0  ;;  %v2379_v31 = vsel %vm842_vm2, %v2365_v62, 0.0  ;;  %v2388_v16 = vsel %vm842_vm2, %v2368_v13, 0.0  ;;  %v2382_v58 = vsel %vm842_vm2, %v2366_v56, 0.0  ;;  %v2940_v22 = vld [vmem:[%s3996_s22] ss:$0 sm:$0xff] }
 0xa7d   : > { %2386 = vadd.xlane.f32.xlu1 %v2385_v41  ;;  %2380 = vadd.xlane.f32.xlu0 %v2379_v31  ;;  %v2941_v10 = vld [vmem:[%s3997_s0] ss:$0 sm:$0xff] }
 0xa85   : > { %2389 = vadd.xlane.f32.xlu1 %v2388_v16  ;;  %2383 = vadd.xlane.f32.xlu0 %v2382_v58 }
 0xaf0   : > { %v2387_v18 = vpop.xlane.xlu1 %2386  ;;  %v2381_v17 = vpop.xlane.xlu0 %2380 }
 0xaf1   : > { %v2393_v57 = vmul.f32 %v2387_v18, %v3232_v43  ;;  %v2391_v63 = vmul.f32 %v2381_v17, %v3232_v43 }
 0xaf3   : > { %v3897_v33 = vsub.f32 %v2367_v12, %v2393_v57  ;;  %v2395_v38 = vsub.f32 %v2365_v62, %v2391_v63 }
 0xaf5   : > { %v2401_v14 = vmul.f32 %v3897_v33, %v3897_v33  ;;  %v2399_v19 = vmul.f32 %v2395_v38, %v2395_v38 }
 0xaf7   : > { %v2409_v8 = vsel %vm842_vm2, %v2401_v14, 0.0  ;;  %v2403_v46 = vsel %vm842_vm2, %v2399_v19, 0.0 }
 0xaf8   : > { %v2390_v1 = vpop.xlane.xlu1 %2389  ;;  %2410 = vadd.xlane.f32.xlu0 %v2409_v8  ;;  %2404 = vadd.xlane.f32.xlu2 %v2403_v46  ;;  %v2384_v25 = vpop.xlane.xlu0 %2383 }
 0xaf9   : > { %v2394_v9 = vmul.f32 %v2390_v1, %v3232_v43  ;;  %v2392_v24 = vmul.f32 %v2384_v25, %v3232_v43 }
 0xafb   : > { %v3905_v36 = vsub.f32 %v2368_v13, %v2394_v9  ;;  %v3907_v26 = vsub.f32 %v2366_v56, %v2392_v24 }
 0xafd   : > { %v2402_v3 = vmul.f32 %v3905_v36, %v3905_v36  ;;  %v2400_v23 = vmul.f32 %v3907_v26, %v3907_v26 }
 0xaff   : > { %v2412_v27 = vsel %vm842_vm2, %v2402_v3, 0.0  ;;  %v2406_v4 = vsel %vm842_vm2, %v2400_v23, 0.0 }
 0xb00   : > { %2413 = vadd.xlane.f32.xlu1 %v2412_v27  ;;  %2407 = vadd.xlane.f32.xlu2 %v2406_v4 }
 0xb6b   : > { %v2405_v29 = vpop.xlane.xlu2 %2404  ;;  %v2411_v34 = vpop.xlane.xlu0 %2410 }
 0xb6c   : > { %v2415_v59 = vmul.f32 %v2405_v29, %v3232_v43  ;;  %v2417_v28 = vmul.f32 %v2411_v34, %v3232_v43 }
 0xb6e   : > { %v2419_v37 = vadd.f32 1e-05, %v2415_v59  ;;  %v2421_v39 = vadd.f32 1e-05, %v2417_v28 }
 0xb70   : > { %2942 = vrsqrt.f32 %v2419_v37  ;;  %vm2429_vm14 = vweird.f32 %v2419_v37  ;;  %vm2449_vm1 = vweird.f32 %v2421_v39 }
 0xb71   : > { %2944 = vrsqrt.f32 %v2421_v39 }
 0xb73   : > { %v2414_v55 = vpop.xlane.xlu1 %2413  ;;  %v2408_v40 = vpop.xlane.xlu2 %2407 }
 0xb74   : > { %v2418_v6 = vmul.f32 %v2414_v55, %v3232_v43  ;;  %v2416_v20 = vmul.f32 %v2408_v40, %v3232_v43 }
 0xb76   : > { %v2943_v44 = vpop.eup %2942  ;;  %v2422_v45 = vadd.f32 1e-05, %v2418_v6  ;;  %v2420_v50 = vadd.f32 1e-05, %v2416_v20 }
 0xb77   : > { %v2945_v15 = vpop.eup %2944  ;;  %v2424_v51 = vmul.f32 %v2943_v44, %v2419_v37  ;;  %vm2430_vm12 = vweird.f32 %v2943_v44 }
 0xb78   : > { %v2444_v52 = vmul.f32 %v2945_v15, %v2421_v39  ;;  %2946 = vrsqrt.f32 %v2422_v45  ;;  %vm2450_vm13 = vweird.f32 %v2945_v15  ;;  %vm2431_vm15 = vmor %vm2429_vm14, %vm2430_vm12  ;;  %vm2459_vm5 = vweird.f32 %v2422_v45 }
 0xb79   : > { %v2425_v47 = vmul.f32 %v2943_v44, %v2424_v51  ;;  %2948 = vrsqrt.f32 %v2420_v50  ;;  %vm2451_vm3 = vmor %vm2449_vm1, %vm2450_vm13  ;;  %vm2439_vm7 = vweird.f32 %v2420_v50 }
 0xb7a   : > { %v2445_v42 = vmul.f32 %v2945_v15, %v2444_v52 }
 0xb7b   : > { %v2426_v54 = vmul.f32 0.5, %v2425_v47 }
 0xb7c   : > { %v2446_v49 = vmul.f32 0.5, %v2445_v42 }
 0xb7d   : > { %v2427_v32 = vsub.f32 1.5, %v2426_v54 }
 0xb7e   : > { %v2947_v7 = vpop.eup %2946  ;;  %v2447_v30 = vsub.f32 1.5, %v2446_v49 }
 0xb7f   : > { %v2949_v60 = vpop.eup %2948  ;;  %v2428_v61 = vmul.f32 %v2943_v44, %v2427_v32  ;;  %v2454_v43 = vmul.f32 %v2947_v7, %v2422_v45  ;;  %vm2460_vm0 = vweird.f32 %v2947_v7 }
 0xb80   : > { %v2448_v48 = vmul.f32 %v2945_v15, %v2447_v30  ;;  %v2434_v0 = vmul.f32 %v2949_v60, %v2420_v50  ;;  %vm2440_vm4 = vweird.f32 %v2949_v60  ;;  %vm2461_vm6 = vmor %vm2459_vm5, %vm2460_vm0 }
 0xb81   : > { %v2432_v35 = vsel %vm2431_vm15, %v2943_v44, %v2428_v61  ;;  %v2455_v62 = vmul.f32 %v2947_v7, %v2454_v43  ;;  %vm2441_vm8 = vmor %vm2439_vm7, %vm2440_vm4 }
 0xb82   : > { %v2463_v53 = vmul.f32 %v2432_v35, %v2395_v38  ;;  %v2452_v56 = vsel %vm2451_vm3, %v2945_v15, %v2448_v48  ;;  %v2435_v2 = vmul.f32 %v2949_v60, %v2434_v0 }
 0xb83   : > { %v2465_v11 = vmul.f32 %v2452_v56, %v3897_v33  ;;  %v2456_v12 = vmul.f32 0.5, %v2455_v62 }
 0xb84   : > { %v2470_v5 = vmul.f32 %v2940_v22, %v2463_v53  ;;  %v2436_v21 = vmul.f32 0.5, %v2435_v2 }
 0xb85   : > { %v2472_v13 = vmul.f32 %v2940_v22, %v2465_v11  ;;  %v2457_v41 = vsub.f32 1.5, %v2456_v12 }
 0xb86   : > { %v2477_v31 = vadd.f32 %v2941_v10, %v2470_v5  ;;  %v2437_v16 = vsub.f32 1.5, %v2436_v21 }
 0xb87   : > { %v2479_v58 = vadd.f32 %v2941_v10, %v2472_v13  ;;  %v2458_v18 = vmul.f32 %v2947_v7, %v2457_v41 }
 0xb88   : > { %2481 = vst.msk [vmem:[#allocation4] sm:$0xff] %vm842_vm2, %v2477_v31  ;;  %v2438_v17 = vmul.f32 %v2949_v60, %v2437_v16 }
 0xb89   : > { %2483 = vst.msk [vmem:[#allocation4 + $0x10] sm:$0xff] %vm842_vm2, %v2479_v58  ;;  %v2462_v57 = vsel %vm2461_vm6, %v2947_v7, %v2458_v18 }
 0xb8a   : > { %v2466_v63 = vmul.f32 %v2462_v57, %v3905_v36  ;;  %v2442_v33 = vsel %vm2441_vm8, %v2949_v60, %v2438_v17 }
 0xb8b   : > { %v2464_v38 = vmul.f32 %v2442_v33, %v3907_v26 }
 0xb8c   : > { %v2473_v14 = vmul.f32 %v2940_v22, %v2466_v63 }
 0xb8d   : > { %v2471_v19 = vmul.f32 %v2940_v22, %v2464_v38 }
 0xb8e   : > { %v2480_v8 = vadd.f32 %v2941_v10, %v2473_v14 }
 0xb8f   : > { %v2478_v46 = vadd.f32 %v2941_v10, %v2471_v19 }
 0xb90   : > { %2484 = vst.msk [vmem:[#allocation4 + $0x18] sm:$0xff] %vm842_vm2, %v2480_v8 }
 0xb91   : > { %2482 = vst.msk [vmem:[#allocation4 + $0x8] sm:$0xff] %vm842_vm2, %v2478_v46 }
 0xb92 PF: > { %p2761_p6 = scmp.eq.s32.totalorder %s3114_s30, 1  ;;  %s3006_s7 = smov [#allocation4]  }
 0xb93   : > { %s2490_s26 = sshll.u32 %s3006_s7, 4  ;;  %s3998_s17 = sld [smem:[#allocation17_spill]]  ;;  %s2491_s26 = int_to_ptr.vmem [resolvable:$true] %s2490_s26 }
 0xb94   : > { %s3007_s9 = smov 128  }
 0xb99   : > { %s2492_s27 = sshll.u32 %s3998_s17, 4  ;;  %s2493_s27 = int_to_ptr.hbm [resolvable:$true] %s2492_s27 }
 0xb9a   : > { %2758 = dma.vmem_to_hbm [thread:$0]  (%p2761_p6), %s2491_s26, 512, %s2493_s27, [#allocation5], %s3007_s9, %s3007_s9, %s3002_s19  }
 0xb9b   : > { %2983 = dma.done.wait (%p2761_p6), [#allocation5], 512  }
 0xb9c   : > { %2985 = vsyncadd (%p2761_p6), [#allocation5], 4294966784 }
 0xb9d PF: > { %s3999_s2 = sld [smem:[#allocation7_spill]] }
 0xba3   : > { %s30_s0 = sadd.s32 1, %s3999_s2  }
 0xba4   : > { %p27_p7 = scmp.ge.s32.totalorder %s30_s0, 4  }
 0xba6   :  { %29 = sbr.rel (!%p27_p7) target bundleno = 11 (0xb), region = 164 }
 0xbab   :  { %2509 = vsyncpa [#allocation5], 1 }
 0xbac   :  { %2511 = vsyncpa [#allocation5 + $0x1], 1 }

</bundles_post_ra>
